<compile_context>
chip_gen: v6e
topology: v6e:2x2x1
jax: 0.10.0
libtpu: 0.0.40
codegen_flags: <defaults>
</compile_context>

<pallas_src>
import jax
import jax.numpy as jnp
from jax.experimental import pallas as pl
from jax.experimental.pallas import tpu as pltpu

MEL = 80          # real mel channels
MELP = 128        # lane-padded mel channels (unmasked 128-lane stores)
EPS = 1e-4


def decoder_kernel(contents_ref, speaker_ref,
                   w_c1_ref,
                   w_r1_ref, b_r1_ref,
                   w_r2_ref, b_r2_ref,
                   w_up_ref, b_up_ref,
                   w_lin_ref, b_lin_ref,
                   out_ref,
                   pad_x, pad_h):
    B, T, Dp = contents_ref.shape
    BT = B * T

    # Zero only the per-batch-element halo rows of the padded bf16 scratches
    # (interior rows are fully rewritten every step).  Re-done every grid step
    # so it stays correct if the parallel batch axis is sharded across cores.
    zx = jnp.zeros((B, 1, Dp), jnp.bfloat16)
    zh = jnp.zeros((B, 1, 128), jnp.bfloat16)
    pad_x[:, 0:1, :] = zx
    pad_x[:, T + 1:T + 2, :] = zx
    pad_h[:, 0:1, :] = zh
    pad_h[:, T + 1:T + 2, :] = zh

    def l2norm(x):
        # x / (||x|| + eps)  (matches Decoder.norm; reciprocal on the idle EUP)
        n = jnp.sqrt(jnp.sum(x * x, axis=-1, keepdims=True))
        return x * pl.reciprocal(n + EPS, approx=True)

    c = contents_ref[...].astype(jnp.float32)     # (B, T, Dp)
    s = speaker_ref[...].astype(jnp.float32)      # (B, T, Dp)
    x = l2norm(c) + l2norm(s)                     # (B, T, Dp) f32

    def conv3(pad_ref, cin, w_fused_ref, bias):
        # 'same' k=3 conv as ONE fused K=3*cin matmul over B*T rows; the three
        # taps are bf16 ref-view slices of the zero-padded scratch.
        taps = jnp.concatenate(
            [pad_ref[:, 0:T, :],                  # x[t-1]
             pad_ref[:, 1:T + 1, :],              # x[t]
             pad_ref[:, 2:T + 2, :]],             # x[t+1]
            axis=-1)                              # (B, T, 3*cin) bf16
        acc = jnp.dot(taps.reshape(BT, 3 * cin), w_fused_ref[...],
                      preferred_element_type=jnp.float32)
        if bias is not None:
            acc = acc + bias                      # (1, Cout) broadcasts
        return acc                                # (B*T, Cout) f32

    # --- mm.Conv1d(in, 128, k=3, bias=False, 'same'), no activation ---
    pad_x[:, 1:T + 1, :] = x.astype(jnp.bfloat16)
    h = conv3(pad_x, Dp, w_c1_ref, None)          # (BT, 128) f32

    # --- two Conv1dResBlocks: x + relu(conv3(x) + b) ---
    # TODO(synk): exact mm.Conv1dResBlock internals unknown; single-conv residual assumed.
    pad_h[:, 1:T + 1, :] = h.astype(jnp.bfloat16).reshape(B, T, 128)
    h = h + jax.nn.relu(conv3(pad_h, 128, w_r1_ref, b_r1_ref[...]))
    pad_h[:, 1:T + 1, :] = h.astype(jnp.bfloat16).reshape(B, T, 128)
    h = h + jax.nn.relu(conv3(pad_h, 128, w_r2_ref, b_r2_ref[...]))

    # --- Upsample(x2, nearest) fused with Conv1d(128->256, k=2, 'same', ReLU) ---
    # u[j] = h[j//2]; k=2 'same' pad = (left=0, right=1):
    #   out[2s]   = relu(h[s]@w0 + h[s]@w1   + b) = relu(p0 + p1      + b)
    #   out[2s+1] = relu(h[s]@w0 + h[s+1]@w1 + b) = relu(p0 + p1[s+1] + b)
    # Single MXU push: fused weight [w0|w1] -> (BT, 512) = [p0 | p1].
    hb = h.astype(jnp.bfloat16)
    p = jnp.dot(hb, w_up_ref[...], preferred_element_type=jnp.float32)  # (BT, 512)
    p0 = p[:, :256]
    p1 = p[:, 256:]
    b_up = b_up_ref[...]                                                # (1, 256)
    even = jax.nn.relu(p0 + p1 + b_up)
    # p1[s+1] within each batch element, zero at s = T-1 (no scratch round-trip).
    p1_next = jnp.concatenate(
        [p1.reshape(B, T, 256)[:, 1:, :],
         jnp.zeros((B, 1, 256), jnp.float32)], axis=1).reshape(BT, 256)
    odd = jax.nn.relu(p0 + p1_next + b_up)

    # --- mm.Linear(256, mel) as ONE dot over stacked even/odd rows ---
    eo = jnp.concatenate([even, odd], axis=0).astype(jnp.bfloat16)      # (2BT, 256)
    mel = jnp.dot(eo, w_lin_ref[...],
                  preferred_element_type=jnp.float32) + b_lin_ref[...]  # (2BT, 128)

    # One 256-lane output row per input timestep: [even_mel | odd_mel].
    out_val = jnp.concatenate([mel[:BT, :], mel[BT:, :]], axis=-1)      # (BT, 256)
    out_ref[...] = out_val.reshape(B, T, 2 * MELP).astype(out_ref.dtype)


def _choose_batch_fold(N, T):
    """Pick B (batch elems / grid step) so M = B*T reaches ~512 rows (2x the
    256-row MXU), capped at 1024 rows to bound per-step VMEM, while keeping
    >= 2 grid steps when N allows (v7x has 2 TensorCores)."""
    best = 1
    for b in range(1, N + 1):
        if N % b != 0:
            continue
        if N >= 2 and N // b < 2:
            break
        if best * T >= 512:
            break
        if b * T > 1024:
            break
        best = b
    return best


def decoder_forward(contents, speaker_emb, params):
    N, T, D = contents.shape
    w_c1, w_r1, b_r1, w_r2, b_r2, w_up, b_up, w_lin, b_lin = params

    # --- one-time (outside kernel) prep: lane-pad channels, tap-fuse conv
    #     weights, fuse the two upsample taps, bf16 weight storage, lane-pad
    #     the final linear ---
    Dp = ((D + 127) // 128) * 128
    if Dp != D:
        pc = Dp - D
        contents = jnp.pad(contents, ((0, 0), (0, 0), (0, pc)))
        speaker_emb = jnp.pad(speaker_emb, ((0, 0), (0, 0), (0, pc)))
        w_c1 = jnp.pad(w_c1, ((0, 0), (0, pc), (0, 0)))   # zero rows: no effect

    w_c1_f = w_c1.reshape(3 * Dp, 128).astype(jnp.bfloat16)
    w_r1_f = w_r1.reshape(3 * 128, 128).astype(jnp.bfloat16)
    w_r2_f = w_r2.reshape(3 * 128, 128).astype(jnp.bfloat16)
    w_up_f = jnp.concatenate([w_up[0], w_up[1]], axis=-1).astype(jnp.bfloat16)  # (128,512)
    w_lin_p = jnp.pad(w_lin, ((0, 0), (0, MELP - MEL))).astype(jnp.bfloat16)
    b_lin_p = jnp.pad(b_lin, ((0, 0), (0, MELP - MEL))).astype(jnp.float32)
    b_r1 = b_r1.astype(jnp.float32)
    b_r2 = b_r2.astype(jnp.float32)
    b_up = b_up.astype(jnp.float32)

    B = _choose_batch_fold(N, T)
    grid = (N // B,)

    # TODO(synk): for production-length T add an "arbitrary" T-tile grid axis
    # with a 1-row carried halo so the whole-T-resident design fits v7x's
    # 64 MiB VMEM; also accept bf16 contents/speaker_emb if the producer can
    # emit them (halves input DMA).
    out = pl.pallas_call(
        decoder_kernel,
        grid=grid,
        in_specs=[
            pl.BlockSpec((B, T, Dp), lambda n: (n, 0, 0)),       # contents
            pl.BlockSpec((B, T, Dp), lambda n: (n, 0, 0)),       # speaker_emb
            pl.BlockSpec((3 * Dp, 128), lambda n: (0, 0)),       # w_c1 (tap-fused)
            pl.BlockSpec((384, 128), lambda n: (0, 0)),          # w_r1 (tap-fused)
            pl.BlockSpec((1, 128), lambda n: (0, 0)),            # b_r1
            pl.BlockSpec((384, 128), lambda n: (0, 0)),          # w_r2 (tap-fused)
            pl.BlockSpec((1, 128), lambda n: (0, 0)),            # b_r2
            pl.BlockSpec((128, 512), lambda n: (0, 0)),          # w_up (tap-fused)
            pl.BlockSpec((1, 256), lambda n: (0, 0)),            # b_up
            pl.BlockSpec((256, MELP), lambda n: (0, 0)),         # w_lin (padded)
            pl.BlockSpec((1, MELP), lambda n: (0, 0)),           # b_lin (padded)
        ],
        out_specs=pl.BlockSpec((B, T, 2 * MELP), lambda n: (n, 0, 0)),
        out_shape=jax.ShapeDtypeStruct((N, T, 2 * MELP), jnp.bfloat16),
        scratch_shapes=[
            pltpu.VMEM((B, T + 2, Dp), jnp.bfloat16),    # zero-padded conv1 input
            pltpu.VMEM((B, T + 2, 128), jnp.bfloat16),   # zero-padded res-conv input
        ],
        compiler_params=pltpu.CompilerParams(
            dimension_semantics=("parallel",),
            vmem_limit_bytes=32 * 1024 * 1024),          # fixes v5e's 16 MiB default
    )(contents, speaker_emb, w_c1_f, w_r1_f, b_r1, w_r2_f, b_r2,
      w_up_f, b_up, w_lin_p, b_lin_p)

    # Layout glue: (N, T, 256) = [even128 | odd128] per row -> contiguous
    # reshape interleaves even/odd into the upsampled time axis, then drop the
    # mel padding lanes.  Output stays bf16.
    # TODO(synk): fuse the :MEL slice into the consumer to avoid this HBM pass.
    mel = out.reshape(N, 2 * T, MELP)[:, :, :MEL]
    return mel


def init_params(key, in_channels):
    ks = jax.random.split(key, 9)
    scale = 0.05
    w_c1 = scale * jax.random.normal(ks[0], (3, in_channels, 128), jnp.float32)
    w_r1 = scale * jax.random.normal(ks[1], (3, 128, 128), jnp.float32)
    b_r1 = scale * jax.random.normal(ks[2], (1, 128), jnp.float32)
    w_r2 = scale * jax.random.normal(ks[3], (3, 128, 128), jnp.float32)
    b_r2 = scale * jax.random.normal(ks[4], (1, 128), jnp.float32)
    w_up = scale * jax.random.normal(ks[5], (2, 128, 256), jnp.float32)
    b_up = scale * jax.random.normal(ks[6], (1, 256), jnp.float32)
    w_lin = scale * jax.random.normal(ks[7], (256, MEL), jnp.float32)
    b_lin = scale * jax.random.normal(ks[8], (1, MEL), jnp.float32)
    return (w_c1, w_r1, b_r1, w_r2, b_r2, w_up, b_up, w_lin, b_lin)


if __name__ == "__main__":
    key = jax.random.PRNGKey(0)
    k_in, k_c, k_s = jax.random.split(key, 3)

    N, T, Z = 2, 8, 32            # batch, seq, z_dim (in_channels)
    contents = jax.random.normal(k_c, (N, T, Z), jnp.float32)
    speaker_emb = jax.random.normal(k_s, (N, T, Z), jnp.float32)
    params = init_params(k_in, Z)

    mel = decoder_forward(contents, speaker_emb, params)
    mel = jax.block_until_ready(mel)
    assert mel.shape == (N, 2 * T, MEL), mel.shape
    print("KERNEL_OK")
</pallas_src>

<mosaic_0001>
module attributes {stable_mosaic.version = 11 : i64} {
  func.func @decoder_kernel(%arg0: i32, %arg1: memref<1x8x128xf32, #tpu.memory_space<vmem>>, %arg2: memref<1x8x128xf32, #tpu.memory_space<vmem>>, %arg3: memref<384x128xbf16, #tpu.memory_space<vmem>>, %arg4: memref<384x128xbf16, #tpu.memory_space<vmem>>, %arg5: memref<1x128xf32, #tpu.memory_space<vmem>>, %arg6: memref<384x128xbf16, #tpu.memory_space<vmem>>, %arg7: memref<1x128xf32, #tpu.memory_space<vmem>>, %arg8: memref<128x512xbf16, #tpu.memory_space<vmem>>, %arg9: memref<1x256xf32, #tpu.memory_space<vmem>>, %arg10: memref<256x128xbf16, #tpu.memory_space<vmem>>, %arg11: memref<1x128xf32, #tpu.memory_space<vmem>>, %arg12: memref<1x8x256xbf16, #tpu.memory_space<vmem>>, %arg13: memref<1x10x128xbf16, #tpu.memory_space<vmem>>, %arg14: memref<1x10x128xbf16, #tpu.memory_space<vmem>>) attributes {dimension_semantics = [#tpu.dimension_semantics<parallel>], iteration_bounds = array<i64: 2>, scalar_prefetch = 0 : i64, scratch_operands = 2 : i64, tpu.core_type = #tpu.core_type<tc>, window_params = [{transform_indices = @transform_0, window_bounds = array<i64: 1, 8, 128>}, {transform_indices = @transform_1, window_bounds = array<i64: 1, 8, 128>}, {pipeline_mode = #tpu.pipeline_mode<synchronous>, transform_indices = @transform_2, window_bounds = array<i64: 384, 128>}, {pipeline_mode = #tpu.pipeline_mode<synchronous>, transform_indices = @transform_3, window_bounds = array<i64: 384, 128>}, {pipeline_mode = #tpu.pipeline_mode<synchronous>, transform_indices = @transform_4, window_bounds = array<i64: 1, 128>}, {pipeline_mode = #tpu.pipeline_mode<synchronous>, transform_indices = @transform_5, window_bounds = array<i64: 384, 128>}, {pipeline_mode = #tpu.pipeline_mode<synchronous>, transform_indices = @transform_6, window_bounds = array<i64: 1, 128>}, {pipeline_mode = #tpu.pipeline_mode<synchronous>, transform_indices = @transform_7, window_bounds = array<i64: 128, 512>}, {pipeline_mode = #tpu.pipeline_mode<synchronous>, transform_indices = @transform_8, window_bounds = array<i64: 1, 256>}, {pipeline_mode = #tpu.pipeline_mode<synchronous>, transform_indices = @transform_9, window_bounds = array<i64: 256, 128>}, {pipeline_mode = #tpu.pipeline_mode<synchronous>, transform_indices = @transform_10, window_bounds = array<i64: 1, 128>}, {transform_indices = @transform_11, window_bounds = array<i64: 1, 8, 256>}]} {
    %cst = arith.constant 0.000000e+00 : bf16
    %0 = vector.broadcast %cst : bf16 to vector<1x1x128xbf16>
    %cst_0 = arith.constant 0.000000e+00 : bf16
    %1 = vector.broadcast %cst_0 : bf16 to vector<1x1x128xbf16>
    %c0 = arith.constant 0 : index
    %c0_1 = arith.constant 0 : index
    %c0_2 = arith.constant 0 : index
    %2 = vector.load %arg13[%c0, %c0_1, %c0_2] : memref<1x10x128xbf16, #tpu.memory_space<vmem>>, vector<1x1x128xbf16>
    tpu.vector_store %arg13[%c0, %c0_1, %c0_2], %0 {strides = array<i32>} : memref<1x10x128xbf16, #tpu.memory_space<vmem>>, vector<1x1x128xbf16>,
    %c0_3 = arith.constant 0 : index
    %c9 = arith.constant 9 : index
    %c0_4 = arith.constant 0 : index
    %3 = vector.load %arg13[%c0_3, %c9, %c0_4] : memref<1x10x128xbf16, #tpu.memory_space<vmem>>, vector<1x1x128xbf16>
    tpu.vector_store %arg13[%c0_3, %c9, %c0_4], %0 {strides = array<i32>} : memref<1x10x128xbf16, #tpu.memory_space<vmem>>, vector<1x1x128xbf16>,
    %c0_5 = arith.constant 0 : index
    %c0_6 = arith.constant 0 : index
    %c0_7 = arith.constant 0 : index
    %4 = vector.load %arg14[%c0_5, %c0_6, %c0_7] : memref<1x10x128xbf16, #tpu.memory_space<vmem>>, vector<1x1x128xbf16>
    tpu.vector_store %arg14[%c0_5, %c0_6, %c0_7], %1 {strides = array<i32>} : memref<1x10x128xbf16, #tpu.memory_space<vmem>>, vector<1x1x128xbf16>,
    %c0_8 = arith.constant 0 : index
    %c9_9 = arith.constant 9 : index
    %c0_10 = arith.constant 0 : index
    %5 = vector.load %arg14[%c0_8, %c9_9, %c0_10] : memref<1x10x128xbf16, #tpu.memory_space<vmem>>, vector<1x1x128xbf16>
    tpu.vector_store %arg14[%c0_8, %c9_9, %c0_10], %1 {strides = array<i32>} : memref<1x10x128xbf16, #tpu.memory_space<vmem>>, vector<1x1x128xbf16>,
    %c0_11 = arith.constant 0 : index
    %c0_12 = arith.constant 0 : index
    %c0_13 = arith.constant 0 : index
    %6 = vector.load %arg1[%c0_11, %c0_12, %c0_13] : memref<1x8x128xf32, #tpu.memory_space<vmem>>, vector<1x8x128xf32>
    %c0_14 = arith.constant 0 : index
    %c0_15 = arith.constant 0 : index
    %c0_16 = arith.constant 0 : index
    %7 = vector.load %arg2[%c0_14, %c0_15, %c0_16] : memref<1x8x128xf32, #tpu.memory_space<vmem>>, vector<1x8x128xf32>
    %8 = arith.mulf %6, %6 : vector<1x8x128xf32>
    %cst_17 = arith.constant dense<0.000000e+00> : vector<1x8xf32>
    %9 = vector.multi_reduction <add>, %8, %cst_17 [2] : vector<1x8x128xf32> to vector<1x8xf32>
    %10 = vector.shape_cast %9 : vector<1x8xf32> to vector<1x8x1xf32>
    %11 = math.sqrt %10 : vector<1x8x1xf32>
    %cst_18 = arith.constant 9.99999974E-5 : f32
    %12 = vector.broadcast %cst_18 : f32 to vector<1x8x1xf32>
    %13 = arith.addf %11, %12 : vector<1x8x1xf32>
    %14 = tpu.reciprocal %13 {approx = true} : vector<1x8x1xf32> -> vector<1x8x1xf32>
    %15 = vector.broadcast %14 : vector<1x8x1xf32> to vector<1x8x128xf32>
    %16 = arith.mulf %6, %15 : vector<1x8x128xf32>
    %17 = arith.mulf %7, %7 : vector<1x8x128xf32>
    %cst_19 = arith.constant dense<0.000000e+00> : vector<1x8xf32>
    %18 = vector.multi_reduction <add>, %17, %cst_19 [2] : vector<1x8x128xf32> to vector<1x8xf32>
    %19 = vector.shape_cast %18 : vector<1x8xf32> to vector<1x8x1xf32>
    %20 = math.sqrt %19 : vector<1x8x1xf32>
    %cst_20 = arith.constant 9.99999974E-5 : f32
    %21 = vector.broadcast %cst_20 : f32 to vector<1x8x1xf32>
    %22 = arith.addf %20, %21 : vector<1x8x1xf32>
    %23 = tpu.reciprocal %22 {approx = true} : vector<1x8x1xf32> -> vector<1x8x1xf32>
    %24 = vector.broadcast %23 : vector<1x8x1xf32> to vector<1x8x128xf32>
    %25 = arith.mulf %7, %24 : vector<1x8x128xf32>
    %26 = arith.addf %16, %25 : vector<1x8x128xf32>
    %27 = arith.truncf %26 : vector<1x8x128xf32> to vector<1x8x128xbf16>
    %c0_21 = arith.constant 0 : index
    %c1 = arith.constant 1 : index
    %c0_22 = arith.constant 0 : index
    %28 = vector.load %arg13[%c0_21, %c1, %c0_22] : memref<1x10x128xbf16, #tpu.memory_space<vmem>>, vector<1x8x128xbf16>
    tpu.vector_store %arg13[%c0_21, %c1, %c0_22], %27 {strides = array<i32>} : memref<1x10x128xbf16, #tpu.memory_space<vmem>>, vector<1x8x128xbf16>,
    %c0_23 = arith.constant 0 : index
    %c0_24 = arith.constant 0 : index
    %c0_25 = arith.constant 0 : index
    %29 = vector.load %arg13[%c0_23, %c0_24, %c0_25] : memref<1x10x128xbf16, #tpu.memory_space<vmem>>, vector<1x8x128xbf16>
    %c0_26 = arith.constant 0 : index
    %c1_27 = arith.constant 1 : index
    %c0_28 = arith.constant 0 : index
    %30 = vector.load %arg13[%c0_26, %c1_27, %c0_28] : memref<1x10x128xbf16, #tpu.memory_space<vmem>>, vector<1x8x128xbf16>
    %c0_29 = arith.constant 0 : index
    %c2 = arith.constant 2 : index
    %c0_30 = arith.constant 0 : index
    %31 = vector.load %arg13[%c0_29, %c2, %c0_30] : memref<1x10x128xbf16, #tpu.memory_space<vmem>>, vector<1x8x128xbf16>
    %32 = tpu.concatenate %29, %30, %31 in 2 : vector<1x8x128xbf16>, vector<1x8x128xbf16>, vector<1x8x128xbf16> -> vector<1x8x384xbf16>
    %33 = vector.shape_cast %32 : vector<1x8x384xbf16> to vector<8x384xbf16>
    %c0_31 = arith.constant 0 : index
    %c0_32 = arith.constant 0 : index
    %34 = vector.load %arg3[%c0_31, %c0_32] : memref<384x128xbf16, #tpu.memory_space<vmem>>, vector<384x128xbf16>
    %cst_33 = arith.constant dense<0.000000e+00> : vector<8x128xf32>
    %35 = tpu.matmul %33, %34, %cst_33 {dimension_numbers = #tpu.dot_dimension_numbers<[1], [0], [0], [1], [0, 0, 1, 1], [], []>} : vector<8x384xbf16>, vector<384x128xbf16>, vector<8x128xf32> -> vector<8x128xf32>
    %36 = arith.truncf %35 : vector<8x128xf32> to vector<8x128xbf16>
    %37 = vector.shape_cast %36 : vector<8x128xbf16> to vector<1x8x128xbf16>
    %c0_34 = arith.constant 0 : index
    %c1_35 = arith.constant 1 : index
    %c0_36 = arith.constant 0 : index
    %38 = vector.load %arg14[%c0_34, %c1_35, %c0_36] : memref<1x10x128xbf16, #tpu.memory_space<vmem>>, vector<1x8x128xbf16>
    tpu.vector_store %arg14[%c0_34, %c1_35, %c0_36], %37 {strides = array<i32>} : memref<1x10x128xbf16, #tpu.memory_space<vmem>>, vector<1x8x128xbf16>,
    %c0_37 = arith.constant 0 : index
    %c0_38 = arith.constant 0 : index
    %39 = vector.load %arg5[%c0_37, %c0_38] : memref<1x128xf32, #tpu.memory_space<vmem>>, vector<1x128xf32>
    %c0_39 = arith.constant 0 : index
    %c0_40 = arith.constant 0 : index
    %c0_41 = arith.constant 0 : index
    %40 = vector.load %arg14[%c0_39, %c0_40, %c0_41] : memref<1x10x128xbf16, #tpu.memory_space<vmem>>, vector<1x8x128xbf16>
    %c0_42 = arith.constant 0 : index
    %c1_43 = arith.constant 1 : index
    %c0_44 = arith.constant 0 : index
    %41 = vector.load %arg14[%c0_42, %c1_43, %c0_44] : memref<1x10x128xbf16, #tpu.memory_space<vmem>>, vector<1x8x128xbf16>
    %c0_45 = arith.constant 0 : index
    %c2_46 = arith.constant 2 : index
    %c0_47 = arith.constant 0 : index
    %42 = vector.load %arg14[%c0_45, %c2_46, %c0_47] : memref<1x10x128xbf16, #tpu.memory_space<vmem>>, vector<1x8x128xbf16>
    %43 = tpu.concatenate %40, %41, %42 in 2 : vector<1x8x128xbf16>, vector<1x8x128xbf16>, vector<1x8x128xbf16> -> vector<1x8x384xbf16>
    %44 = vector.shape_cast %43 : vector<1x8x384xbf16> to vector<8x384xbf16>
    %c0_48 = arith.constant 0 : index
    %c0_49 = arith.constant 0 : index
    %45 = vector.load %arg4[%c0_48, %c0_49] : memref<384x128xbf16, #tpu.memory_space<vmem>>, vector<384x128xbf16>
    %cst_50 = arith.constant dense<0.000000e+00> : vector<8x128xf32>
    %46 = tpu.matmul %44, %45, %cst_50 {dimension_numbers = #tpu.dot_dimension_numbers<[1], [0], [0], [1], [0, 0, 1, 1], [], []>} : vector<8x384xbf16>, vector<384x128xbf16>, vector<8x128xf32> -> vector<8x128xf32>
    %47 = vector.broadcast %39 : vector<1x128xf32> to vector<8x128xf32>
    %48 = arith.addf %46, %47 : vector<8x128xf32>
    %cst_51 = arith.constant 0.000000e+00 : f32
    %49 = vector.broadcast %cst_51 : f32 to vector<8x128xf32>
    %50 = arith.maximumf %48, %49 : vector<8x128xf32>
    %51 = arith.addf %35, %50 : vector<8x128xf32>
    %52 = arith.truncf %51 : vector<8x128xf32> to vector<8x128xbf16>
    %53 = vector.shape_cast %52 : vector<8x128xbf16> to vector<1x8x128xbf16>
    %c0_52 = arith.constant 0 : index
    %c1_53 = arith.constant 1 : index
    %c0_54 = arith.constant 0 : index
    %54 = vector.load %arg14[%c0_52, %c1_53, %c0_54] : memref<1x10x128xbf16, #tpu.memory_space<vmem>>, vector<1x8x128xbf16>
    tpu.vector_store %arg14[%c0_52, %c1_53, %c0_54], %53 {strides = array<i32>} : memref<1x10x128xbf16, #tpu.memory_space<vmem>>, vector<1x8x128xbf16>,
    %c0_55 = arith.constant 0 : index
    %c0_56 = arith.constant 0 : index
    %55 = vector.load %arg7[%c0_55, %c0_56] : memref<1x128xf32, #tpu.memory_space<vmem>>, vector<1x128xf32>
    %c0_57 = arith.constant 0 : index
    %c0_58 = arith.constant 0 : index
    %c0_59 = arith.constant 0 : index
    %56 = vector.load %arg14[%c0_57, %c0_58, %c0_59] : memref<1x10x128xbf16, #tpu.memory_space<vmem>>, vector<1x8x128xbf16>
    %c0_60 = arith.constant 0 : index
    %c1_61 = arith.constant 1 : index
    %c0_62 = arith.constant 0 : index
    %57 = vector.load %arg14[%c0_60, %c1_61, %c0_62] : memref<1x10x128xbf16, #tpu.memory_space<vmem>>, vector<1x8x128xbf16>
    %c0_63 = arith.constant 0 : index
    %c2_64 = arith.constant 2 : index
    %c0_65 = arith.constant 0 : index
    %58 = vector.load %arg14[%c0_63, %c2_64, %c0_65] : memref<1x10x128xbf16, #tpu.memory_space<vmem>>, vector<1x8x128xbf16>
    %59 = tpu.concatenate %56, %57, %58 in 2 : vector<1x8x128xbf16>, vector<1x8x128xbf16>, vector<1x8x128xbf16> -> vector<1x8x384xbf16>
    %60 = vector.shape_cast %59 : vector<1x8x384xbf16> to vector<8x384xbf16>
    %c0_66 = arith.constant 0 : index
    %c0_67 = arith.constant 0 : index
    %61 = vector.load %arg6[%c0_66, %c0_67] : memref<384x128xbf16, #tpu.memory_space<vmem>>, vector<384x128xbf16>
    %cst_68 = arith.constant dense<0.000000e+00> : vector<8x128xf32>
    %62 = tpu.matmul %60, %61, %cst_68 {dimension_numbers = #tpu.dot_dimension_numbers<[1], [0], [0], [1], [0, 0, 1, 1], [], []>} : vector<8x384xbf16>, vector<384x128xbf16>, vector<8x128xf32> -> vector<8x128xf32>
    %63 = vector.broadcast %55 : vector<1x128xf32> to vector<8x128xf32>
    %64 = arith.addf %62, %63 : vector<8x128xf32>
    %cst_69 = arith.constant 0.000000e+00 : f32
    %65 = vector.broadcast %cst_69 : f32 to vector<8x128xf32>
    %66 = arith.maximumf %64, %65 : vector<8x128xf32>
    %67 = arith.addf %51, %66 : vector<8x128xf32>
    %68 = arith.truncf %67 : vector<8x128xf32> to vector<8x128xbf16>
    %c0_70 = arith.constant 0 : index
    %c0_71 = arith.constant 0 : index
    %69 = vector.load %arg8[%c0_70, %c0_71] : memref<128x512xbf16, #tpu.memory_space<vmem>>, vector<128x512xbf16>
    %cst_72 = arith.constant dense<0.000000e+00> : vector<8x512xf32>
    %70 = tpu.matmul %68, %69, %cst_72 {dimension_numbers = #tpu.dot_dimension_numbers<[1], [0], [0], [1], [0, 0, 1, 1], [], []>} : vector<8x128xbf16>, vector<128x512xbf16>, vector<8x512xf32> -> vector<8x512xf32>
    %71 = vector.extract_strided_slice %70 {offsets = [0, 0], sizes = [8, 256], strides = [1, 1]} : vector<8x512xf32> to vector<8x256xf32>
    %72 = vector.extract_strided_slice %70 {offsets = [0, 256], sizes = [8, 256], strides = [1, 1]} : vector<8x512xf32> to vector<8x256xf32>
    %c0_73 = arith.constant 0 : index
    %c0_74 = arith.constant 0 : index
    %73 = vector.load %arg9[%c0_73, %c0_74] : memref<1x256xf32, #tpu.memory_space<vmem>>, vector<1x256xf32>
    %74 = arith.addf %71, %72 : vector<8x256xf32>
    %75 = vector.broadcast %73 : vector<1x256xf32> to vector<8x256xf32>
    %76 = arith.addf %74, %75 : vector<8x256xf32>
    %cst_75 = arith.constant 0.000000e+00 : f32
    %77 = vector.broadcast %cst_75 : f32 to vector<8x256xf32>
    %78 = arith.maximumf %76, %77 : vector<8x256xf32>
    %79 = vector.shape_cast %72 : vector<8x256xf32> to vector<1x8x256xf32>
    %80 = vector.extract_strided_slice %79 {offsets = [0, 1, 0], sizes = [1, 7, 256], strides = [1, 1, 1]} : vector<1x8x256xf32> to vector<1x7x256xf32>
    %cst_76 = arith.constant 0.000000e+00 : f32
    %81 = vector.broadcast %cst_76 : f32 to vector<1x1x256xf32>
    %82 = tpu.concatenate %80, %81 in 1 : vector<1x7x256xf32>, vector<1x1x256xf32> -> vector<1x8x256xf32>
    %83 = vector.shape_cast %82 : vector<1x8x256xf32> to vector<8x256xf32>
    %84 = arith.addf %71, %83 : vector<8x256xf32>
    %85 = vector.broadcast %73 : vector<1x256xf32> to vector<8x256xf32>
    %86 = arith.addf %84, %85 : vector<8x256xf32>
    %cst_77 = arith.constant 0.000000e+00 : f32
    %87 = vector.broadcast %cst_77 : f32 to vector<8x256xf32>
    %88 = arith.maximumf %86, %87 : vector<8x256xf32>
    %89 = tpu.concatenate %78, %88 in 0 : vector<8x256xf32>, vector<8x256xf32> -> vector<16x256xf32>
    %90 = arith.truncf %89 : vector<16x256xf32> to vector<16x256xbf16>
    %c0_78 = arith.constant 0 : index
    %c0_79 = arith.constant 0 : index
    %91 = vector.load %arg10[%c0_78, %c0_79] : memref<256x128xbf16, #tpu.memory_space<vmem>>, vector<256x128xbf16>
    %cst_80 = arith.constant dense<0.000000e+00> : vector<16x128xf32>
    %92 = tpu.matmul %90, %91, %cst_80 {dimension_numbers = #tpu.dot_dimension_numbers<[1], [0], [0], [1], [0, 0, 1, 1], [], []>} : vector<16x256xbf16>, vector<256x128xbf16>, vector<16x128xf32> -> vector<16x128xf32>
    %c0_81 = arith.constant 0 : index
    %c0_82 = arith.constant 0 : index
    %93 = vector.load %arg11[%c0_81, %c0_82] : memref<1x128xf32, #tpu.memory_space<vmem>>, vector<1x128xf32>
    %94 = vector.broadcast %93 : vector<1x128xf32> to vector<16x128xf32>
    %95 = arith.addf %92, %94 : vector<16x128xf32>
    %96 = vector.extract_strided_slice %95 {offsets = [0, 0], sizes = [8, 128], strides = [1, 1]} : vector<16x128xf32> to vector<8x128xf32>
    %97 = vector.extract_strided_slice %95 {offsets = [8, 0], sizes = [8, 128], strides = [1, 1]} : vector<16x128xf32> to vector<8x128xf32>
    %98 = tpu.concatenate %96, %97 in 1 : vector<8x128xf32>, vector<8x128xf32> -> vector<8x256xf32>
    %99 = vector.shape_cast %98 : vector<8x256xf32> to vector<1x8x256xf32>
    %100 = arith.truncf %99 : vector<1x8x256xf32> to vector<1x8x256xbf16>
    %c0_83 = arith.constant 0 : index
    %c0_84 = arith.constant 0 : index
    %c0_85 = arith.constant 0 : index
    %101 = vector.load %arg12[%c0_83, %c0_84, %c0_85] : memref<1x8x256xbf16, #tpu.memory_space<vmem>>, vector<1x8x256xbf16>
    tpu.vector_store %arg12[%c0_83, %c0_84, %c0_85], %100 {strides = array<i32>} : memref<1x8x256xbf16, #tpu.memory_space<vmem>>, vector<1x8x256xbf16>,
    return
  }
  func.func @transform_0(%arg0: i32) -> (i32, i32, i32) {
    %c0_i32 = arith.constant 0 : i32
    %c0_i32_0 = arith.constant 0 : i32
    %c0_i32_1 = arith.constant 0 : i32
    return %arg0, %c0_i32, %c0_i32_0 : i32, i32, i32
  }
  func.func @transform_1(%arg0: i32) -> (i32, i32, i32) {
    %c0_i32 = arith.constant 0 : i32
    %c0_i32_0 = arith.constant 0 : i32
    %c0_i32_1 = arith.constant 0 : i32
    return %arg0, %c0_i32, %c0_i32_0 : i32, i32, i32
  }
  func.func @transform_2(%arg0: i32) -> (i32, i32) {
    %c0_i32 = arith.constant 0 : i32
    %c0_i32_0 = arith.constant 0 : i32
    %c0_i32_1 = arith.constant 0 : i32
    return %c0_i32, %c0_i32_0 : i32, i32
  }
  func.func @transform_3(%arg0: i32) -> (i32, i32) {
    %c0_i32 = arith.constant 0 : i32
    %c0_i32_0 = arith.constant 0 : i32
    %c0_i32_1 = arith.constant 0 : i32
    return %c0_i32, %c0_i32_0 : i32, i32
  }
  func.func @transform_4(%arg0: i32) -> (i32, i32) {
    %c0_i32 = arith.constant 0 : i32
    %c0_i32_0 = arith.constant 0 : i32
    %c0_i32_1 = arith.constant 0 : i32
    return %c0_i32, %c0_i32_0 : i32, i32
  }
  func.func @transform_5(%arg0: i32) -> (i32, i32) {
    %c0_i32 = arith.constant 0 : i32
    %c0_i32_0 = arith.constant 0 : i32
    %c0_i32_1 = arith.constant 0 : i32
    return %c0_i32, %c0_i32_0 : i32, i32
  }
  func.func @transform_6(%arg0: i32) -> (i32, i32) {
    %c0_i32 = arith.constant 0 : i32
    %c0_i32_0 = arith.constant 0 : i32
    %c0_i32_1 = arith.constant 0 : i32
    return %c0_i32, %c0_i32_0 : i32, i32
  }
  func.func @transform_7(%arg0: i32) -> (i32, i32) {
    %c0_i32 = arith.constant 0 : i32
    %c0_i32_0 = arith.constant 0 : i32
    %c0_i32_1 = arith.constant 0 : i32
    return %c0_i32, %c0_i32_0 : i32, i32
  }
  func.func @transform_8(%arg0: i32) -> (i32, i32) {
    %c0_i32 = arith.constant 0 : i32
    %c0_i32_0 = arith.constant 0 : i32
    %c0_i32_1 = arith.constant 0 : i32
    return %c0_i32, %c0_i32_0 : i32, i32
  }
  func.func @transform_9(%arg0: i32) -> (i32, i32) {
    %c0_i32 = arith.constant 0 : i32
    %c0_i32_0 = arith.constant 0 : i32
    %c0_i32_1 = arith.constant 0 : i32
    return %c0_i32, %c0_i32_0 : i32, i32
  }
  func.func @transform_10(%arg0: i32) -> (i32, i32) {
    %c0_i32 = arith.constant 0 : i32
    %c0_i32_0 = arith.constant 0 : i32
    %c0_i32_1 = arith.constant 0 : i32
    return %c0_i32, %c0_i32_0 : i32, i32
  }
  func.func @transform_11(%arg0: i32) -> (i32, i32, i32) {
    %c0_i32 = arith.constant 0 : i32
    %c0_i32_0 = arith.constant 0 : i32
    %c0_i32_1 = arith.constant 0 : i32
    return %arg0, %c0_i32, %c0_i32_0 : i32, i32, i32
  }
}

</mosaic_0001>

<bundles_post_ra>
// kernel: tpu_custom_call.1
= control target key start
LH: loop header
LB: loop body
LE: loop exit
PB: predicated region body
PF: predicated region fallthrough
CT: control target
= control target key end

     0   :  { %s3472_s0 = inlined_call_operand.hbm [shape: f32[2,8,128], index: 0, kind: input, shape index: {}]   ;;  %s3473_s1 = inlined_call_operand.hbm [shape: f32[2,8,128], index: 1, kind: input, shape index: {}]   ;;  %s3474_s2 = inlined_call_operand.hbm [shape: bf16[384,128], index: 2, kind: input, shape index: {}]   ;;  %s3475_s3 = inlined_call_operand.hbm [shape: bf16[384,128], index: 3, kind: input, shape index: {}]   ;;  %s3476_s4 = inlined_call_operand.vmem [shape: f32[1,128], index: 4, kind: input, shape index: {}]   ;;  %s3477_s5 = inlined_call_operand.hbm [shape: bf16[384,128], index: 5, kind: input, shape index: {}]   ;;  %s3478_s6 = inlined_call_operand.vmem [shape: f32[1,128], index: 6, kind: input, shape index: {}]   ;;  %s3479_s7 = inlined_call_operand.hbm [shape: bf16[128,512], index: 7, kind: input, shape index: {}]   ;;  %s3480_s8 = inlined_call_operand.vmem [shape: f32[1,256], index: 8, kind: input, shape index: {}]   ;;  %s3481_s9 = inlined_call_operand.hbm [shape: bf16[256,128], index: 9, kind: input, shape index: {}]   ;;  %s3482_s10 = inlined_call_operand.vmem [shape: f32[1,128], index: 10, kind: input, shape index: {}]   ;;  %s3483_s11 = inlined_call_operand.hbm [shape: bf16[2,8,256], index: 11, kind: output, shape index: {}]  }
   0x1   :  { %3495 = sst [smem:[#allocation26_spill]] %s3474_s2 }
   0x2   :  { %3496 = sst [smem:[#allocation27_spill]] %s3475_s3 }
   0x3   :  { %3497 = sst [smem:[#allocation28_spill]] %s3477_s5 }
   0x4   :  { %3498 = sst [smem:[#allocation29_spill]] %s3479_s7 }
   0x5   :  { %3499 = sst [smem:[#allocation30_spill]] %s3481_s9 }
   0x6   :  { %16 = vsyncpa [#allocation5], 0 }
   0x7   :  { %18 = vsyncpa [#allocation5 + $0x1], 0 }
   0x8   :  { %19 = vsyncpa [#allocation8], 0 }
   0x9   :  { %21 = vsyncpa [#allocation8 + $0x1], 0 }
   0xa   :  { %22 = vsyncpa [#allocation11], 0 }
   0xb   :  { %23 = vsyncpa [#allocation14], 0 }
   0xc   :  { %24 = vsyncpa [#allocation6], 0 }
   0xd   :  { %26 = vsyncpa [#allocation6 + $0x1], 0  ;;  %s3107_s17 = smov 0   ;;  %s3109_s18 = smov 0  }
   0xe   :  { %s3111_s19 = smov 0   ;;  %s3113_s20 = smov 0  }
   0xf LB: > { %3500 = sst [smem:[#allocation23_spill]] %s3026_s19  ;;  %s3032_s21 = smov [#allocation9]   ;;  %s3030_s20 = sphi %s3113_s20, %s3534_s20   ;;  %s3026_s19 = sphi %s3111_s19, %s3536_s19   ;;  %s3022_s18 = sphi %s3109_s18, %s3538_s18   ;;  %s3018_s17 = sphi %s3107_s17, %s3537_s17  }
  0x10   : > { %s316_s22 = sshll.u32 %s3032_s21, 4  ;;  %s3128_s23 = sadd.s32 4294967295, %s3030_s20   ;;  %s317_s22 = int_to_ptr.vmem [resolvable:$true] %s316_s22 }
  0x11   : > { %p2167_p0 = scmp.ge.s32.totalorder %s3030_s20, 1  ;;  %p3491_p1 = scmp.eq.s32.totalorder %s3128_s23, 0 }
  0x12   : > { %p304_p2 = scmp.lt.s32.totalorder %s3030_s20, 3  ;;  %s3033_s25 = smov [#allocation10]  }
  0x13   : > { %s329_s26 = sshll.u32 %s3033_s25, 4  ;;  %s3034_s28 = smov [#allocation13]   ;;  %s3146_s26 = int_to_ptr.vmem [resolvable:$true] %s329_s26 }
  0x14   : > { %p3133_p3 = pnand %p2167_p0, %p304_p2  ;;  %s361_s29 = sshll.u32 %s3034_s28, 4  ;;  %s3148_s29 = int_to_ptr.vmem [resolvable:$true] %s361_s29 }
  0x15   : > { %s2775_s12 = scalar_lea.vmem %s317_s22, 3072  ;;  %p2783_p11 = scmp.lt.s32.totalorder %s317_s22, %s317_s22 }
  0x16   : > { %s3501_s24 = scalar_select %p3133_p3, 1, 0 }
  0x17   : > { %p2531_p5 = pneg %p3133_p3  ;;  %p2776_p8 = scmp.ne.s32.totalorder %s317_s22, %s2775_s12 }
  0x18   : > { %p2784_p12 = scmp.lt.s32.totalorder %s2775_s12, %s2775_s12 }
  0x19   : > { %p3142_p6 = pnand %p2531_p5, %p3491_p1 }
  0x1a   : > { %p2785_p13 = por %p2784_p12, %p2783_p11 }
  0x1b   : > { %p3152_p7 = pneg %p3142_p6 }
  0x1d   : > { %p2778_p9 = pnand %p2776_p8, %p3152_p7 }
  0x1f   : > { %p2779_p10 = pneg %p2778_p9 }
  0x21   : > { %p2786_p0 = pnand %p2785_p13, %p2779_p10 }
  0x23   : > { %2789 = shalt.err (!%p2786_p0)
}
  0x24   : > { %s3484_s13 = smov 64   ;;  %s3486_s14 = smov 4  }
  0x25   : > { %s3504_s2 = sld [smem:[#allocation26_spill]]  ;;  %s2801_s21 = scalar_lea.vmem %s3146_s26, 3072 }
  0x26   : > { %p2802_p2 = scmp.ne.s32.totalorder %s3146_s26, %s2801_s21  ;;  %p2809_p9 = scmp.lt.s32.totalorder %s3146_s26, %s3146_s26 }
  0x27   : > { %p2810_p10 = scmp.lt.s32.totalorder %s2801_s21, %s2801_s21 }
  0x28   : > { %p2804_p5 = pnand %p2802_p2, %p3152_p7 }
  0x29   : > { %p2811_p11 = por %p2810_p10, %p2809_p9 }
  0x2a   : > { %p2805_p8 = pneg %p2804_p5 }
  0x2b   : > { %2534 = dma.hbm_to_vmem [thread:$0]  (!%p3142_p6), %s3504_s2, 3072, %s317_s22, [#allocation8], %s3484_s13, %s3484_s13, %s3486_s14  }
  0x2c   : > { %p2812_p12 = pnand %p2811_p11, %p2805_p8 }
  0x2e   : > { %2815 = shalt.err (!%p2812_p12)
}
  0x2f   : > { %s3505_s3 = sld [smem:[#allocation27_spill]]  ;;  %s2827_s22 = scalar_lea.vmem %s3148_s29, 4096 }
  0x30   : > { %p2828_p13 = scmp.ne.s32.totalorder %s3148_s29, %s2827_s22  ;;  %p2835_p5 = scmp.lt.s32.totalorder %s3148_s29, %s3148_s29 }
  0x31   : > { %p2836_p8 = scmp.lt.s32.totalorder %s2827_s22, %s2827_s22 }
  0x32   : > { %p2830_p0 = pnand %p2828_p13, %p3152_p7 }
  0x33   : > { %p2837_p9 = por %p2836_p8, %p2835_p5 }
  0x34   : > { %p2831_p2 = pneg %p2830_p0 }
  0x35   : > { %2537 = dma.hbm_to_vmem [thread:$0]  (!%p3142_p6), %s3505_s3, 3072, %s3146_s26, [#allocation11], %s3484_s13, %s3484_s13, %s3486_s14  }
  0x36   : > { %p2838_p10 = pnand %p2837_p9, %p2831_p2 }
  0x38   : > { %2841 = shalt.err (!%p2838_p10)
}
  0x39   : > { %s3037_s12 = smov 256   ;;  %s3038_s15 = smov 16  }
  0x3a   : > { %s3506_s7 = sld [smem:[#allocation29_spill]]  ;;  %s3039_s26 = smov [#allocation12]  }
  0x3b   : > { %s345_s25 = sshll.u32 %s3039_s26, 4  ;;  %s3040_s28 = smov [#allocation15]   ;;  %s346_s25 = int_to_ptr.vmem [resolvable:$true] %s345_s25 }
  0x3c   : > { %s377_s13 = sshll.u32 %s3040_s28, 4  ;;  %s2853_s14 = scalar_lea.vmem %s346_s25, 3072  ;;  %s378_s13 = int_to_ptr.vmem [resolvable:$true] %s377_s13 }
  0x3d   : > { %p2854_p11 = scmp.ne.s32.totalorder %s346_s25, %s2853_s14  ;;  %p2861_p0 = scmp.lt.s32.totalorder %s346_s25, %s346_s25 }
  0x3e   : > { %p2862_p2 = scmp.lt.s32.totalorder %s2853_s14, %s2853_s14 }
  0x3f   : > { %p2856_p12 = pnand %p2854_p11, %p3152_p7 }
  0x40   : > { %2543 = dma.hbm_to_vmem [thread:$0]  (!%p3142_p6), %s3506_s7, 4096, %s3148_s29, [#allocation14], %s3037_s12, %s3037_s12, %s3038_s15  }
  0x41   : > { %p2857_p13 = pneg %p2856_p12  ;;  %p2863_p5 = por %p2862_p2, %p2861_p0 }
  0x43   : > { %p2864_p8 = pnand %p2863_p5, %p2857_p13 }
  0x45   : > { %2867 = shalt.err (!%p2864_p8)
}
  0x46   : > { %s3507_s22 = smov 4   ;;  %s3508_s16 = smov 64  }
  0x47   : > { %s3509_s5 = sld [smem:[#allocation28_spill]]  ;;  %s2879_s15 = scalar_lea.vmem %s378_s13, 2048 }
  0x48   : > { %p2880_p9 = scmp.ne.s32.totalorder %s378_s13, %s2879_s15  ;;  %p2887_p12 = scmp.lt.s32.totalorder %s378_s13, %s378_s13 }
  0x49   : > { %p2888_p0 = scmp.lt.s32.totalorder %s2879_s15, %s2879_s15 }
  0x4a   : > { %p2882_p10 = pnand %p2880_p9, %p3152_p7 }
  0x4b   : > { %p2889_p13 = por %p2888_p0, %p2887_p12 }
  0x4c   : > { %p2883_p11 = pneg %p2882_p10 }
  0x4d   : > { %2540 = dma.hbm_to_vmem [thread:$0]  (!%p3142_p6), %s3509_s5, 3072, %s346_s25, [#allocation11], %s3508_s16, %s3508_s16, %s3507_s22  }
  0x4e   : > { %p2890_p2 = pnand %p2889_p13, %p2883_p11 }
  0x50   : > { %2893 = shalt.err (!%p2890_p2)
}
  0x51   : > { %s3510_s9 = sld [smem:[#allocation30_spill]]  ;;  %s2166_s27 = sadd.s32 4294967294, %s3030_s20  }
  0x52   : > { %s3215_s30 = sadd.s32 1, %s3030_s20   ;;  %s39_s26 = sadd.s32 1, %s3026_s19 }
  0x53   : > { %3511 = sst [smem:[#allocation24_spill]] %s3215_s30  ;;  %s36_s25 = ssub.s32 %s3030_s20, %s3215_s30 }
  0x54   : > { %p46_p7 = scmp.ne.s32.totalorder %s3026_s19, %s3022_s18  ;;  %p37_p5 = scmp.eq.s32.totalorder %s36_s25, 0 }
  0x55   : > { %p47_p8 = scmp.eq.s32.totalorder %s3030_s20, 0  ;;  %p52_p9 = scmp.ne.s32.totalorder %s3022_s18, %s3018_s17 }
  0x56   : > { %p291_p10 = scmp.eq.s32.totalorder %s3128_s23, 1  ;;  %p297_p0 = scmp.eq.s32.totalorder %s2166_s27, 1 }
  0x57   : > { %2546 = dma.hbm_to_vmem [thread:$0]  (!%p3142_p6), %s3510_s9, 2048, %s378_s13, [#allocation14], %s3508_s16, %s3508_s16, %s3507_s22  }
  0x58   : > { %s3227_s28 = scalar_select %p37_p5, %s3026_s19, %s39_s26  }
  0x59   : > { %p48_p11 = por %p47_p8, %p46_p7  ;;  %p3231_p12 = por %p3491_p1, %p52_p9 }
  0x5a   : > { %3512 = sst [smem:[#allocation25_spill]] %s3227_s28  ;;  %p3235_p6 = por %p291_p10, %p46_p7 }
  0x5b   : > { %s3513_s29 = scalar_select %p3231_p12, 1, 0 }
  0x5c   : > { %s3514_s13 = scalar_select %p3235_p6, 1, 0 }
  0x5d   : > { %p2563_p13 = scmp.lt.s32.totalorder %s3030_s20, 2  ;;  %s394_s22 = sand.u32 1, %s3026_s19  }
  0x5e   : > { %p3241_p2 = por %p297_p0, %p52_p9  ;;  %s3245_s12 = sshll.u32 %s394_s22, 3 }
  0x5f   : > { %s2175_s15 = sshll.u32 %s3030_s20, 7  ;;  %s398_s25 = scalar_lea.vmem [#allocation4], %s3245_s12 }
  0x60   : > { %s3515_s16 = scalar_select %p3241_p2, 1, 0 }
  0x61   : > { %s3251_s26 = scalar_lea.hbm %s3472_s0, %s2175_s15  ;;  %s405_s27 = sshll.u32 %s398_s25, 4  ;;  %s406_s27 = int_to_ptr.vmem [resolvable:$true] %s405_s27 }
  0x62   : > { %p3254_p7 = pnand %p2563_p13, %p48_p11  ;;  %s3261_s7 = scalar_lea.hbm %s3473_s1, %s2175_s15 }
  0x63   : > { %s395_s14 = scalar_lea.sflag [#allocation5], %s394_s22  ;;  %s2894_s21 = scalar_lea.hbm %s3251_s26, 128 }
  0x64   : > { %p2895_p5 = scmp.ne.s32.totalorder %s3251_s26, %s2894_s21  ;;  %p2896_p8 = pneg %p3254_p7 }
  0x65   : > { %s2899_s28 = scalar_lea.hbm %s3472_s0, 256  ;;  %p2900_p11 = scmp.lt.s32.totalorder %s3251_s26, %s3472_s0 }
  0x66   : > { %p2897_p9 = pnand %p2896_p8, %p2895_p5  ;;  %p2901_p0 = scmp.lt.s32.totalorder %s2899_s28, %s2894_s21 }
  0x68   : > { %p2898_p10 = pneg %p2897_p9  ;;  %p2902_p13 = por %p2901_p0, %p2900_p11 }
  0x6a   : > { %p2903_p4 = pnand %p2902_p13, %p2898_p10 }
  0x6c   : > { %2906 = shalt.err (!%p2903_p4)
}
  0x6d   : > { %s2907_s3 = scalar_lea.vmem %s406_s27, 128  ;;  %s3041_s5 = smov [#allocation4]  }
  0x6e   : > { %p2908_p1 = scmp.ne.s32.totalorder %s406_s27, %s2907_s3  ;;  %s2912_s22 = sshll.u32 %s3041_s5, 4  ;;  %s2913_s22 = int_to_ptr.vmem [resolvable:$false] %s2912_s22 }
  0x6f   : > { %s2914_s9 = scalar_lea.vmem %s2913_s22, 256  ;;  %p2915_p9 = scmp.lt.s32.totalorder %s406_s27, %s2913_s22 }
  0x70   : > { %p2910_p2 = pnand %p2908_p1, %p2896_p8  ;;  %p2916_p6 = scmp.lt.s32.totalorder %s2914_s9, %s2907_s3 }
  0x72   : > { %p2911_p5 = pneg %p2910_p2  ;;  %p2917_p12 = por %p2916_p6, %p2915_p9 }
  0x74   : > { %p2918_p3 = pnand %p2917_p12, %p2911_p5 }
  0x76   : > { %2921 = shalt.err (!%p2918_p3)
}
  0x77   : > { %2550 = dma.hbm_to_vmem [thread:$0]  (!%p3254_p7), %s3251_s26, 128, %s406_s27, %s395_s14  }
  0x78   : > { %s412_s19 = sand.u32 1, %s3030_s20   ;;  %s416_s30 = scalar_lea.vmem [#allocation7], %s3245_s12 }
  0x79   : > { %s423_s28 = sshll.u32 %s416_s30, 4  ;;  %s413_s15 = scalar_lea.sflag [#allocation8], %s412_s19  ;;  %s424_s28 = int_to_ptr.vmem [resolvable:$true] %s423_s28 }
  0x7a   : > { %s2922_s21 = scalar_lea.hbm %s3261_s7, 128  ;;  %s2927_s5 = scalar_lea.hbm %s3473_s1, 256 }
  0x7b   : > { %p2923_p1 = scmp.ne.s32.totalorder %s3261_s7, %s2922_s21  ;;  %p2928_p12 = scmp.lt.s32.totalorder %s3261_s7, %s3473_s1 }
  0x7c   : > { %p2929_p6 = scmp.lt.s32.totalorder %s2927_s5, %s2922_s21 }
  0x7d   : > { %p2925_p3 = pnand %p2923_p1, %p2896_p8 }
  0x7e   : > { %p2930_p2 = por %p2929_p6, %p2928_p12 }
  0x7f   : > { %p2926_p4 = pneg %p2925_p3 }
  0x81   : > { %p2931_p10 = pnand %p2930_p2, %p2926_p4 }
  0x83   : > { %2934 = shalt.err (!%p2931_p10)
}
  0x84   : > { %s2935_s12 = scalar_lea.vmem %s424_s28, 128  ;;  %s3042_s26 = smov [#allocation7]  }
  0x85   : > { %p2936_p11 = scmp.ne.s32.totalorder %s424_s28, %s2935_s12  ;;  %s2940_s27 = sshll.u32 %s3042_s26, 4  ;;  %s2941_s27 = int_to_ptr.vmem [resolvable:$false] %s2940_s27 }
  0x86   : > { %s2942_s14 = scalar_lea.vmem %s2941_s27, 256  ;;  %p2943_p5 = scmp.lt.s32.totalorder %s424_s28, %s2941_s27 }
  0x87   : > { %p2938_p0 = pnand %p2936_p11, %p2896_p8  ;;  %p2944_p9 = scmp.lt.s32.totalorder %s2942_s14, %s2935_s12 }
  0x89   : > { %p2939_p13 = pneg %p2938_p0  ;;  %p2945_p1 = por %p2944_p9, %p2943_p5 }
  0x8b   : > { %p2946_p3 = pnand %p2945_p1, %p2939_p13 }
  0x8d   : > { %2949 = shalt.err (!%p2946_p3)
}
  0x8e   : > { %2553 = dma.hbm_to_vmem [thread:$0]  (!%p3254_p7), %s3261_s7, 128, %s424_s28, %s413_s15  }
  0x8f   : > { %p3517_p4 = scmp.ne.s32.totalorder %s3501_s24, 0 }
  0x90   : > { %s3306_s19 = sand.u32 (!%p3517_p4), 1, %s3022_s18   ;;  %p3518_p8 = scmp.ne.s32.totalorder (!%p3517_p4), %s3513_s29, 0 }
  0x91   : > { %432 = sbr.rel (%p3517_p4) target bundleno = 1464 (0x5b8), region = 64  ;;  %s3309_s30 = sshll.u32 (!%p3517_p4), %s3306_s19, 3 }
  0x92   : > { %s435_s21 = scalar_lea.sflag (!%p3517_p4), [#allocation5], %s3306_s19  ;;  %s438_s25 = scalar_lea.vmem (!%p3517_p4), [#allocation4], %s3309_s30 }
  0x96   : > { %2993 = dma.done.wait (%p3518_p8), %s435_s21, 128  }
  0x97   : > { %2995 = vsyncadd (%p3518_p8), %s435_s21, 4294967168  ;;  %s443_s2 = sand.u32 1, %s3128_s23   ;;  %s447_s24 = scalar_lea.vmem [#allocation7], %s3309_s30 }
  0x98   : > { %s444_s7 = scalar_lea.sflag [#allocation8], %s443_s2 }
  0x99   : > { %2997 = dma.done.wait (%p3518_p8), %s444_s7, 128  }
  0x9a   : > { %2999 = vsyncadd (%p3518_p8), %s444_s7, 4294967168  ;;  %p3519_p7 = scmp.eq.s32.totalorder %s3128_s23, 0 }
  0x9c   : > { %3001 = dma.done.wait (%p3519_p7), [#allocation8], 3072   ;;  %p3520_p12 = pmov %p3519_p7 }
  0x9d   : > { %p3521_p6 = pmov %p3519_p7 }
  0x9e   : > { %3003 = vsyncadd (%p3520_p12), [#allocation8], 4294964224 }
  0x9f   : > { %3005 = dma.done.wait (%p3521_p6), [#allocation11], 6144   ;;  %p3522_p2 = pmov %p3521_p6 }
  0xa1   : > { %3007 = vsyncadd (%p3522_p2), [#allocation11], 4294961152  ;;  %p3523_p10 = pmov %p3522_p2 }
  0xa2   : > { %p3524_p11 = pmov %p3522_p2 }
  0xa3   : > { %3009 = dma.done.wait (%p3523_p10), [#allocation14], 6144  }
  0xa4   : > { %3011 = vsyncadd (%p3524_p11), [#allocation14], 4294961152  ;;  %v3335_v0 = vld [vmem:[%s438_s25] sm:$0xff]  ;;  %v3337_v1 = vld [vmem:[%s447_s24] sm:$0xff]  ;;  %v3043_v5 = vmov 0.0   ;;  %vm512_vm0 = vcmask 1040384  }
  0xa5   : > { %v531_v2 = vmul.f32 %v3335_v0, %v3335_v0  ;;  %v544_v3 = vmul.f32 %v3337_v1, %v3337_v1  ;;  %v2614_v4 = vld [vmem:[#allocation9 + $0xb8] sm:$0xff]   ;;  %2445 = vmatprep.subr.bf16.mxu1 %v3043_v5  ;;  %vm513_vm1 = vsmask.f32 256  ;;  %vm518_vm2 = vsmask.f32 7938  ;;  %v2616_v12 = vld [vmem:[#allocation9 + $0xb0] sm:$0xff]  }
  0xa6   : > { %2446 = vmatpush3.bf16.msra.mxu1 %v2614_v4  ;;  %vm3345_vm3 = vmand %vm512_vm0, %vm513_vm1  ;;  %v515_v7 = vld [vmem:[#allocation2] sm:$0x1]  ;;  %v520_v8 = vld [vmem:[#allocation2 + $0x4] sm:$0x1]  ;;  %vm3044_vm5 = vmmov 0   ;;  %vm572_vm10 = vcmask 1043456  }
  0xa7   : > { %532 = vadd.xlane.f32.xlu0 %v531_v2  ;;  %2447 = vmatprep.subr.bf16.mxu1 %v3043_v5  ;;  %vm3350_vm4 = vmand %vm512_vm0, %vm518_vm2  ;;  %v516_v10 = vsel %vm3345_vm3, 0, %v515_v7  ;;  %v2615_v11 = vld [vmem:[#allocation9 + $0x78] sm:$0xff]   ;;  %v2618_v15 = vld [vmem:[#allocation9 + $0x70] sm:$0xff]   ;;  %vm1815_vm12 = vcmask 1046528   ;;  %s2329_s26 = sshll.u32 %s3128_s23, 7  ;;  %s510_s27 = scalar_lea.vmem [#allocation16], %s3309_s30 }
  0xa8   : > { %517 = vst [vmem:[#allocation2] sm:$0x1] %v516_v10  ;;  %v521_v13 = vsel %vm3350_vm4, 0, %v520_v8  ;;  %v2617_v14 = vld [vmem:[#allocation9 + $0x38] sm:$0xff]   ;;  %2330 = vmatprep.subr.bf16.mxu0 %v2615_v11  ;;  %v2619_v16 = vld [vmem:[#allocation9 + $0xa8] sm:$0xff]   ;;  %v2620_v17 = vld [vmem:[#allocation9 + $0x30] sm:$0xff]   ;;  %2461 = vmatprep.mubr.msk.bf16.mxu1 %vm3044_vm5, %v3043_v5  ;;  %s2024_s2 = scalar_lea.hbm %s3483_s11, %s2329_s26 }
  0xa9   : > { %522 = vst [vmem:[#allocation2 + $0x4] sm:$0x1] %v521_v13  ;;  %2331 = vmatpush3.bf16.msra.mxu0 %v2617_v14  ;;  %v2621_v18 = vld [vmem:[#allocation9 + $0x68] sm:$0xff]   ;;  %v2622_v19 = vld [vmem:[#allocation9 + $0xa0] sm:$0xff]   ;;  %v2625_v22 = vld [vmem:[#allocation9 + $0x98] sm:$0xff]   ;;  %s2026_s14 = sshll.u32 %s510_s27, 4  ;;  %s2027_s14 = int_to_ptr.vmem [resolvable:$true] %s2026_s14 }
  0xaa   : > { %2448 = vmatpush3.bf16.msra.mxu1 %v2616_v12  ;;  %2332 = vmatprep.subr.bf16.mxu0 %v2618_v15  ;;  %v2623_v20 = vld [vmem:[#allocation9 + $0x28] sm:$0xff]   ;;  %v2624_v21 = vld [vmem:[#allocation9 + $0x60] sm:$0xff]   ;;  %v2627_v24 = vld [vmem:[#allocation9 + $0x58] sm:$0xff]   ;;  %s2012_s7 = scalar_lea.sflag [#allocation6], %s3306_s19  ;;  %s2950_s24 = scalar_lea.vmem %s2027_s14, 128 }
  0xab   : > { %545 = vadd.xlane.f32.xlu0 %v544_v3  ;;  %2449 = vmatprep.subr.bf16.mxu1 %v3043_v5  ;;  %v2626_v23 = vld [vmem:[#allocation9 + $0x20] sm:$0xff]   ;;  %v2628_v25 = vld [vmem:[#allocation9 + $0x90] sm:$0xff]   ;;  %v2629_v26 = vld [vmem:[#allocation9 + $0x18] sm:$0xff]   ;;  %p2951_p0 = scmp.ne.s32.totalorder %s2027_s14, %s2950_s24  ;;  %p3531_p13 = scmp.ne.s32.totalorder %s3514_s13, 0 }
  0xac   : > { %v2630_v27 = vld [vmem:[#allocation9 + $0x50] sm:$0xff]   ;;  %v2631_v28 = vld [vmem:[#allocation9 + $0x88] sm:$0xff]   ;;  %v2634_v31 = vld [vmem:[#allocation9 + $0x80] sm:$0xff]   ;;  %s3046_s29 = smov [#allocation16]  }
  0xad   : > { %2333 = vmatpush3.bf16.msra.mxu0 %v2620_v17  ;;  %v2632_v29 = vld [vmem:[#allocation9 + $0x10] sm:$0xff]   ;;  %v2633_v30 = vld [vmem:[#allocation9 + $0x48] sm:$0xff]   ;;  %v2637_v33 = vld [vmem:[#allocation9 + $0x40] sm:$0xff]   ;;  %p2952_p5 = pnand %p2951_p0, %p3531_p13  ;;  %s2954_s28 = sshll.u32 %s3046_s29, 4  ;;  %s2955_s28 = int_to_ptr.vmem [resolvable:$false] %s2954_s28 }
  0xae   : > { %2450 = vmatpush3.bf16.msra.mxu1 %v2619_v16  ;;  %2334 = vmatprep.subr.bf16.mxu0 %v2621_v18  ;;  %v2635_v32 = vld [vmem:[#allocation9 + $0x8] sm:$0xff]   ;;  %v2638_v34 = vld [vmem:[#allocation9] sm:$0xff]   ;;  %vm3370_vm11 = vmand %vm572_vm10, %vm518_vm2  ;;  %s2956_s23 = scalar_lea.vmem %s2955_s28, 256  ;;  %p2957_p1 = scmp.lt.s32.totalorder %s2027_s14, %s2955_s28 }
  0xaf   : > { %2451 = vmatprep.subr.bf16.mxu1 %v3043_v5  ;;  %v574_v59 = vld [vmem:[#allocation2] sm:$0xf]  ;;  %v2640_v14 = vld [vmem:[#allocation10 + $0xb8] sm:$0xff]   ;;  %v2650_v9 = vld [vmem:[#allocation10 + $0x60] sm:$0xff]   ;;  %p2953_p9 = pneg %p2952_p5  ;;  %p2958_p3 = scmp.lt.s32.totalorder %s2956_s23, %s2950_s24 }
  0xb0   : > { %v577_v60 = vld [vmem:[#allocation2 + $0x4] sm:$0x1]  ;;  %v2641_v15 = vld [vmem:[#allocation10 + $0x78] sm:$0xff]  }
  0xb1   : > { %2335 = vmatpush3.bf16.msra.mxu0 %v2623_v20  ;;  %v2642_v16 = vld [vmem:[#allocation10 + $0xb0] sm:$0xff]   ;;  %v2643_v17 = vld [vmem:[#allocation10 + $0x38] sm:$0xff]   ;;  %p2959_p4 = por %p2958_p3, %p2957_p1 }
  0xb2   : > { %2452 = vmatpush3.bf16.msra.mxu1 %v2622_v19  ;;  %2336 = vmatprep.subr.bf16.mxu0 %v2624_v21  ;;  %v523_v18 = vld [vmem:[#allocation3] sm:$0x1]  ;;  %v526_v19 = vld [vmem:[#allocation3 + $0x4] sm:$0x1] }
  0xb3   : > { %2453 = vmatprep.subr.bf16.mxu1 %v3043_v5  ;;  %v524_v20 = vsel %vm3345_vm3, 0, %v523_v18  ;;  %v527_v21 = vsel %vm3350_vm4, 0, %v526_v19  ;;  %v2673_v18 = vld [vmem:[#allocation12 + $0x68] sm:$0xff]   ;;  %v2674_v19 = vld [vmem:[#allocation12 + $0xa0] sm:$0xff]   ;;  %p2960_p8 = pnand %p2959_p4, %p2953_p9 }
  0xb4   : > { %525 = vst [vmem:[#allocation3] sm:$0x1] %v524_v20  ;;  %528 = vst [vmem:[#allocation3 + $0x4] sm:$0x1] %v527_v21  ;;  %v2675_v20 = vld [vmem:[#allocation12 + $0x28] sm:$0xff]   ;;  %v2676_v21 = vld [vmem:[#allocation12 + $0x60] sm:$0xff]  }
  0xb5   : > { %2337 = vmatpush3.bf16.msra.mxu0 %v2626_v23  ;;  %v2645_v23 = vld [vmem:[#allocation10 + $0xa8] sm:$0xff]  }
  0xb6   : > { %2454 = vmatpush3.bf16.msra.mxu1 %v2625_v22  ;;  %2338 = vmatprep.subr.bf16.mxu0 %v2627_v24  ;;  %v2644_v22 = vld [vmem:[#allocation10 + $0x70] sm:$0xff]   ;;  %v2701_v58 = vld [vmem:[#allocation13 + $0xc8] ss:$16 sps:$4 sm:$0xff]   ;;  %v2709_v6 = vld [vmem:[#allocation13 + $0xac] ss:$16 sps:$4 sm:$0xff]  }
  0xb7   : > { %2455 = vmatprep.subr.bf16.mxu1 %v3043_v5  ;;  %v2646_v24 = vld [vmem:[#allocation10 + $0x30] sm:$0xff]  }
  0xb9   : > { %2339 = vmatpush3.bf16.msra.mxu0 %v2629_v26  ;;  %v2648_v26 = vld [vmem:[#allocation10 + $0xa0] sm:$0xff]  }
  0xba   : > { %2456 = vmatpush3.bf16.msra.mxu1 %v2628_v25  ;;  %2340 = vmatprep.subr.bf16.mxu0 %v2630_v27  ;;  %v2647_v25 = vld [vmem:[#allocation10 + $0x68] sm:$0xff]  }
  0xbb   : > { %2457 = vmatprep.subr.bf16.mxu1 %v3043_v5  ;;  %v2649_v27 = vld [vmem:[#allocation10 + $0x28] sm:$0xff]  }
  0xbd   : > { %2341 = vmatpush3.bf16.msra.mxu0 %v2632_v29  ;;  %v2652_v29 = vld [vmem:[#allocation10 + $0x20] sm:$0xff]  }
  0xbe   : > { %2458 = vmatpush3.bf16.msra.mxu1 %v2631_v28  ;;  %2342 = vmatprep.subr.bf16.mxu0 %v2633_v30  ;;  %v2651_v28 = vld [vmem:[#allocation10 + $0x98] sm:$0xff]  }
  0xbf   : > { %2459 = vmatprep.subr.bf16.mxu1 %v3043_v5  ;;  %v2653_v30 = vld [vmem:[#allocation10 + $0x58] sm:$0xff]  }
  0xc1   : > { %2343 = vmatpush3.bf16.msra.mxu0 %v2635_v32  ;;  %v2655_v32 = vld [vmem:[#allocation10 + $0x18] sm:$0xff]  }
  0xc2   : > { %2460 = vmatpush3.bf16.msra.mxu1 %v2634_v31  ;;  %2344 = vmatprep.subr.bf16.mxu0 %v2637_v33  ;;  %v2654_v31 = vld [vmem:[#allocation10 + $0x90] sm:$0xff]  }
  0xc3   : > { %2465 = vmatprep.subr.bf16.mxu1 %v3043_v5  ;;  %v2656_v33 = vld [vmem:[#allocation10 + $0x50] sm:$0xff]  }
  0xc5   : > { %2345 = vmatpush3.bf16.msra.mxu0 %v2638_v34  ;;  %v2657_v34 = vld [vmem:[#allocation10 + $0x88] sm:$0xff]  }
  0xc6   : > { %2361 = vmatprep.subr.bf16.mxu0 %v2641_v15  ;;  %v2670_v15 = vld [vmem:[#allocation12 + $0x70] sm:$0xff]  }
 0x130   : > { %v533_v35 = vpop.xlane.xlu0 %532 }
 0x131   : > { %2756 = vrsqrt.f32 %v533_v35  ;;  %vm536_vm6 = vcmp.eq.f32.partialorder %v533_v35, inf  ;;  %v539_v39 = vand.u32 2147483648, %v533_v35  ;;  %vm538_vm7 = vcmp.eq.f32.partialorder %v533_v35, 0.0 }
 0x134   : > { %v546_v36 = vpop.xlane.xlu0 %545 }
 0x135   : > { %2758 = vrsqrt.f32 %v546_v36  ;;  %vm549_vm8 = vcmp.eq.f32.partialorder %v546_v36, inf  ;;  %v552_v45 = vand.u32 2147483648, %v546_v36  ;;  %vm551_vm9 = vcmp.eq.f32.partialorder %v546_v36, 0.0 }
 0x13e   : > { %v2757_v37 = vpop.eup %2756 }
 0x13f   : > { %v535_v38 = vmul.f32 %v2757_v37, %v533_v35  ;;  %v2660_v37 = vld [vmem:[#allocation10 + $0x80] sm:$0xff]  }
 0x141   : > { %v537_v40 = vsel %vm536_vm6, %v533_v35, %v535_v38  ;;  %v2658_v35 = vld [vmem:[#allocation10 + $0x10] sm:$0xff]   ;;  %v2661_v38 = vld [vmem:[#allocation10 + $0x8] sm:$0xff]  }
 0x142   : > { %v2759_v41 = vpop.eup %2758  ;;  %v540_v42 = vsel %vm538_vm7, %v539_v39, %v537_v40  ;;  %v2663_v39 = vld [vmem:[#allocation10 + $0x40] sm:$0xff]  }
 0x143   : > { %v541_v43 = vadd.f32 0.0001, %v540_v42  ;;  %v548_v44 = vmul.f32 %v2759_v41, %v546_v36  ;;  %v2664_v40 = vld [vmem:[#allocation10] sm:$0xff]  }
 0x145   : > { %v550_v46 = vsel %vm549_vm8, %v546_v36, %v548_v44  ;;  %2760 = vrcp.f32 %v541_v43  ;;  %v2659_v36 = vld [vmem:[#allocation10 + $0x48] sm:$0xff]  }
 0x146   : > { %v553_v47 = vsel %vm551_vm9, %v552_v45, %v550_v46 }
 0x147   : > { %v554_v48 = vadd.f32 0.0001, %v553_v47 }
 0x149   : > { %2762 = vrcp.f32 %v554_v48 }
 0x152   : > { %v2761_v49 = vpop.eup %2760 }
 0x153   : > { %v543_v51 = vmul.f32 %v2761_v49, %v3335_v0 }
 0x156   : > { %v2763_v50 = vpop.eup %2762 }
 0x157   : > { %v556_v52 = vmul.f32 %v2763_v50, %v3337_v1 }
 0x159   : > { %v557_v53 = vadd.f32 %v556_v52, %v543_v51 }
 0x15b   : > { %v2325_v54 = vpack.c.bf16 %v557_v53, %v557_v53 }
 0x15d   : > { %v563_v55 = vshrl.u32 %v2325_v54, 16  ;;  %v566_v57 = vshll.u32 %v2325_v54, 16 }
 0x15f   : > { %v565_v56 = vrot.slane %v563_v55, 7  ;;  %v887_v55 = vld [vmem:[#allocation3] sm:$0xf] }
 0x161   : > { %v568_v61 = vor.u32 %v566_v57, %v565_v56  ;;  %v569_v62 = vrot.slane %v565_v56, 4  ;;  %v890_v56 = vld [vmem:[#allocation3 + $0x4] sm:$0x1] }
 0x163   : > { %v575_v63 = vsel %vm3370_vm11, %v568_v61, %v574_v59  ;;  %v578_v0 = vsel %vm3345_vm3, %v569_v62, %v577_v60 }
 0x164   : > { %576 = vst [vmem:[#allocation2] sm:$0xf] %v575_v63  ;;  %579 = vst [vmem:[#allocation2 + $0x4] sm:$0x1] %v578_v0 }
 0x16b   : > { %v581_v1 = vld [vmem:[#allocation2 + $0x4] sm:$0x1]  ;;  %v582_v2 = vld [vmem:[#allocation2] sm:$0xe] }
 0x16c   : > { %v580_v3 = vld [vmem:[#allocation2] sm:$0xf]  ;;  %v2189_v4 = vcombine.low %v582_v2, %v581_v1 }
 0x16d   : > { %v2188_v7 = vcombine.low %v580_v3, %v581_v1 }
 0x16e   : > { %v599_v8 = vrot.slane %v2189_v4, 1 }
 0x16f   : > { %v591_v10 = vshll.u32 %v2188_v7, 16  ;;  %v589_v11 = vshrl.u32 %v2188_v7, 16 }
 0x170   : > { %2462 = vmatmul.mubr.bf16.vlgmr.msra.gmra.mxu1 %v599_v8 }
 0x171   : > { %v593_v12 = vrot.slane %v591_v10, 1  ;;  %2481 = vmatprep.mubr.msk.bf16.mxu1 %vm3044_vm5, %v3043_v5  ;;  %2466 = vmatpush3.bf16.msra.mxu1 %v2640_v14  ;;  %v2669_v14 = vld [vmem:[#allocation12 + $0x38] sm:$0xff]  }
 0x172   : > { %2467 = vmatprep.subr.bf16.mxu1 %v3043_v5 }
 0x173   : > { %v594_v13 = vor.u32 %v593_v12, %v589_v11  ;;  %v2666_v11 = vld [vmem:[#allocation12 + $0xb8] sm:$0xff]  }
 0x174   : > { %v2667_v12 = vld [vmem:[#allocation12 + $0x78] sm:$0xff]  }
 0x175   : > { %825 = vmatprep.mubr.bf16.mxu0 %v594_v13  ;;  %2468 = vmatpush3.bf16.msra.mxu1 %v2642_v16  ;;  %v2668_v13 = vld [vmem:[#allocation12 + $0xb0] sm:$0xff]   ;;  %v2671_v16 = vld [vmem:[#allocation12 + $0xa8] sm:$0xff]  }
 0x176   : > { %826 = vmatmul.mubr.bf16.vlgmr.msra.gmra.mxu0 %v580_v3  ;;  %2469 = vmatprep.subr.bf16.mxu1 %v3043_v5 }
 0x177   : > { %2362 = vmatpush3.bf16.msra.mxu0 %v2643_v17  ;;  %v2672_v17 = vld [vmem:[#allocation12 + $0x30] sm:$0xff]  }
 0x178   : > { %2363 = vmatprep.subr.bf16.mxu0 %v2644_v22  ;;  %v2677_v22 = vld [vmem:[#allocation12 + $0x98] sm:$0xff]  }
 0x179   : > { %2470 = vmatpush3.bf16.msra.mxu1 %v2645_v23  ;;  %v2678_v23 = vld [vmem:[#allocation12 + $0x20] sm:$0xff]  }
 0x17a   : > { %2471 = vmatprep.subr.bf16.mxu1 %v3043_v5 }
 0x17b   : > { %2364 = vmatpush3.bf16.msra.mxu0 %v2646_v24  ;;  %v2679_v24 = vld [vmem:[#allocation12 + $0x58] sm:$0xff]  }
 0x17c   : > { %2365 = vmatprep.subr.bf16.mxu0 %v2647_v25  ;;  %v2680_v25 = vld [vmem:[#allocation12 + $0x90] sm:$0xff]  }
 0x17d   : > { %2472 = vmatpush3.bf16.msra.mxu1 %v2648_v26  ;;  %v2681_v26 = vld [vmem:[#allocation12 + $0x18] sm:$0xff]  }
 0x17e   : > { %2473 = vmatprep.subr.bf16.mxu1 %v3043_v5 }
 0x17f   : > { %2366 = vmatpush3.bf16.msra.mxu0 %v2649_v27  ;;  %v2682_v27 = vld [vmem:[#allocation12 + $0x50] sm:$0xff]  }
 0x180   : > { %2367 = vmatprep.subr.bf16.mxu0 %v2650_v9  ;;  %v2683_v9 = vld [vmem:[#allocation12 + $0x88] sm:$0xff]  }
 0x181   : > { %2474 = vmatpush3.bf16.msra.mxu1 %v2651_v28  ;;  %v2684_v28 = vld [vmem:[#allocation12 + $0x10] sm:$0xff]  }
 0x182   : > { %2475 = vmatprep.subr.bf16.mxu1 %v3043_v5 }
 0x183   : > { %2368 = vmatpush3.bf16.msra.mxu0 %v2652_v29  ;;  %v2685_v29 = vld [vmem:[#allocation12 + $0x48] sm:$0xff]  }
 0x184   : > { %2369 = vmatprep.subr.bf16.mxu0 %v2653_v30  ;;  %v2686_v30 = vld [vmem:[#allocation12 + $0x80] sm:$0xff]  }
 0x185   : > { %2476 = vmatpush3.bf16.msra.mxu1 %v2654_v31  ;;  %v2687_v31 = vld [vmem:[#allocation12 + $0x8] sm:$0xff]  }
 0x186   : > { %2477 = vmatprep.subr.bf16.mxu1 %v3043_v5 }
 0x187   : > { %2370 = vmatpush3.bf16.msra.mxu0 %v2655_v32  ;;  %v2689_v32 = vld [vmem:[#allocation12 + $0x40] sm:$0xff]  }
 0x188   : > { %2371 = vmatprep.subr.bf16.mxu0 %v2656_v33  ;;  %v2690_v33 = vld [vmem:[#allocation12] sm:$0xff]  }
 0x189   : > { %2478 = vmatpush3.bf16.msra.mxu1 %v2657_v34  ;;  %v2694_v34 = vld [vmem:[#allocation13 + $0xe4] ss:$16 sps:$4 sm:$0xff]  }
 0x18a   : > { %2479 = vmatprep.subr.bf16.mxu1 %v3043_v5 }
 0x18b   : > { %2372 = vmatpush3.bf16.msra.mxu0 %v2658_v35  ;;  %v2697_v35 = vld [vmem:[#allocation13 + $0xec] ss:$16 sps:$4 sm:$0xff]  }
 0x18c   : > { %2373 = vmatprep.subr.bf16.mxu0 %v2659_v36 }
 0x18d   : > { %2480 = vmatpush3.bf16.msra.mxu1 %v2660_v37 }
 0x18e   : > { %2485 = vmatprep.subr.bf16.mxu1 %v3043_v5 }
 0x18f   : > { %2374 = vmatpush3.bf16.msra.mxu0 %v2661_v38 }
 0x190   : > { %2375 = vmatprep.subr.bf16.mxu0 %v2663_v39 }
 0x193   : > { %2376 = vmatpush3.bf16.msra.mxu0 %v2664_v40 }
 0x194   : > { %2392 = vmatprep.subr.bf16.mxu0 %v2667_v12  ;;  %v2707_v12 = vld [vmem:[#allocation13 + $0xa8] ss:$16 sps:$4 sm:$0xff]  }
 0x230   : > { %v867_v41 = vpop.f32.mrf.mxu1 }
 0x232   : > { %v2463_v42 = vpop.f32.mrf.mxu1 }
 0x234   : > { %v870_v43 = vpop.f32.mrf.mxu1 }
 0x236   : > { %v2346_v44 = vpop.f32.mrf.mxu0  ;;  %v2464_v45 = vpop.f32.mrf.mxu1 }
 0x238   : > { %v2347_v46 = vpop.f32.mrf.mxu0 }
 0x239   : > { %v2348_v47 = vadd.f32 %v2347_v46, %v2346_v44 }
 0x23a   : > { %v2349_v48 = vpop.f32.mrf.mxu0 }
 0x23b   : > { %v3392_v49 = vadd.f32 %v2348_v47, %v867_v41 }
 0x23c   : > { %v2350_v50 = vpop.f32.mrf.mxu0 }
 0x23d   : > { %v2326_v51 = vpack.c.bf16 %v3392_v49, %v3392_v49 }
 0x23f   : > { %v878_v52 = vshrl.u32 %v2326_v51, 16  ;;  %v881_v54 = vshll.u32 %v2326_v51, 16 }
 0x241   : > { %v880_v53 = vrot.slane %v878_v52, 7 }
 0x243   : > { %v883_v57 = vor.u32 %v881_v54, %v880_v53  ;;  %v884_v59 = vrot.slane %v880_v53, 4 }
 0x245   : > { %v888_v60 = vsel %vm3370_vm11, %v883_v57, %v887_v55  ;;  %v891_v61 = vsel %vm3345_vm3, %v884_v59, %v890_v56 }
 0x246   : > { %889 = vst [vmem:[#allocation3] sm:$0xf] %v888_v60  ;;  %892 = vst [vmem:[#allocation3 + $0x4] sm:$0x1] %v891_v61 }
 0x24d   : > { %v895_v62 = vld [vmem:[#allocation3 + $0x4] sm:$0x1]  ;;  %v896_v63 = vld [vmem:[#allocation3] sm:$0xe] }
 0x24e   : > { %v3400_v0 = vld [vmem:[#allocation3] sm:$0xf]  ;;  %v2216_v1 = vcombine.low %v896_v63, %v895_v62  ;;  %v1211_v56 = vld [vmem:[#allocation3 + $0x4] sm:$0x1] }
 0x24f   : > { %v2215_v2 = vcombine.low %v3400_v0, %v895_v62 }
 0x250   : > { %v913_v3 = vrot.slane %v2216_v1, 1  ;;  %v2695_v1 = vld [vmem:[#allocation13 + $0xe8] ss:$16 sps:$4 sm:$0xff]  }
 0x251   : > { %v905_v4 = vshll.u32 %v2215_v2, 16  ;;  %v903_v7 = vshrl.u32 %v2215_v2, 16 }
 0x252   : > { %2482 = vmatmul.mubr.bf16.vlgmr.msra.gmra.mxu1 %v913_v3 }
 0x253   : > { %v907_v8 = vrot.slane %v905_v4, 1  ;;  %2501 = vmatprep.mubr.msk.bf16.mxu1 %vm3044_vm5, %v3043_v5  ;;  %2486 = vmatpush3.bf16.msra.mxu1 %v2666_v11  ;;  %v2703_v4 = vld [vmem:[#allocation13 + $0xcc] ss:$16 sps:$4 sm:$0xff]   ;;  %v2700_v11 = vld [vmem:[#allocation13 + $0xc4] ss:$16 sps:$4 sm:$0xff]  }
 0x254   : > { %2487 = vmatprep.subr.bf16.mxu1 %v3043_v5 }
 0x255   : > { %v908_v10 = vor.u32 %v907_v8, %v903_v7 }
 0x257   : > { %1145 = vmatprep.mubr.bf16.mxu0 %v908_v10  ;;  %2488 = vmatpush3.bf16.msra.mxu1 %v2668_v13  ;;  %v2692_v10 = vld [vmem:[#allocation13 + $0xe0] ss:$16 sps:$4 sm:$0xff]  }
 0x258   : > { %1146 = vmatmul.mubr.bf16.vlgmr.msra.gmra.mxu0 %v3400_v0  ;;  %2489 = vmatprep.subr.bf16.mxu1 %v3043_v5  ;;  %v2698_v13 = vld [vmem:[#allocation13 + $0xc0] ss:$16 sps:$4 sm:$0xff]  }
 0x259   : > { %2393 = vmatpush3.bf16.msra.mxu0 %v2669_v14  ;;  %v2706_v14 = vld [vmem:[#allocation13 + $0xa4] ss:$16 sps:$4 sm:$0xff]  }
 0x25a   : > { %2394 = vmatprep.subr.bf16.mxu0 %v2670_v15  ;;  %v2704_v15 = vld [vmem:[#allocation13 + $0xa0] ss:$16 sps:$4 sm:$0xff]  }
 0x25b   : > { %2490 = vmatpush3.bf16.msra.mxu1 %v2671_v16  ;;  %v2712_v16 = vld [vmem:[#allocation13 + $0x84] ss:$16 sps:$4 sm:$0xff]  }
 0x25c   : > { %2491 = vmatprep.subr.bf16.mxu1 %v3043_v5 }
 0x25d   : > { %2395 = vmatpush3.bf16.msra.mxu0 %v2672_v17  ;;  %v2715_v17 = vld [vmem:[#allocation13 + $0x8c] ss:$16 sps:$4 sm:$0xff]  }
 0x25e   : > { %2396 = vmatprep.subr.bf16.mxu0 %v2673_v18  ;;  %v2710_v18 = vld [vmem:[#allocation13 + $0x80] ss:$16 sps:$4 sm:$0xff]  }
 0x25f   : > { %2492 = vmatpush3.bf16.msra.mxu1 %v2674_v19  ;;  %v2713_v19 = vld [vmem:[#allocation13 + $0x88] ss:$16 sps:$4 sm:$0xff]  }
 0x260   : > { %2493 = vmatprep.subr.bf16.mxu1 %v3043_v5 }
 0x261   : > { %2397 = vmatpush3.bf16.msra.mxu0 %v2675_v20  ;;  %v2718_v20 = vld [vmem:[#allocation13 + $0x64] ss:$16 sps:$4 sm:$0xff]  }
 0x262   : > { %2398 = vmatprep.subr.bf16.mxu0 %v2676_v21  ;;  %v2721_v21 = vld [vmem:[#allocation13 + $0x6c] ss:$16 sps:$4 sm:$0xff]  }
 0x263   : > { %2494 = vmatpush3.bf16.msra.mxu1 %v2677_v22  ;;  %v2716_v22 = vld [vmem:[#allocation13 + $0x60] ss:$16 sps:$4 sm:$0xff]  }
 0x264   : > { %2495 = vmatprep.subr.bf16.mxu1 %v3043_v5 }
 0x265   : > { %2399 = vmatpush3.bf16.msra.mxu0 %v2678_v23  ;;  %v2719_v23 = vld [vmem:[#allocation13 + $0x68] ss:$16 sps:$4 sm:$0xff]  }
 0x266   : > { %2400 = vmatprep.subr.bf16.mxu0 %v2679_v24  ;;  %v2724_v24 = vld [vmem:[#allocation13 + $0x44] ss:$16 sps:$4 sm:$0xff]  }
 0x267   : > { %2496 = vmatpush3.bf16.msra.mxu1 %v2680_v25  ;;  %v2727_v25 = vld [vmem:[#allocation13 + $0x4c] ss:$16 sps:$4 sm:$0xff]  }
 0x268   : > { %2497 = vmatprep.subr.bf16.mxu1 %v3043_v5 }
 0x269   : > { %2401 = vmatpush3.bf16.msra.mxu0 %v2681_v26  ;;  %v2722_v26 = vld [vmem:[#allocation13 + $0x40] ss:$16 sps:$4 sm:$0xff]  }
 0x26a   : > { %2402 = vmatprep.subr.bf16.mxu0 %v2682_v27  ;;  %v2725_v27 = vld [vmem:[#allocation13 + $0x48] ss:$16 sps:$4 sm:$0xff]  }
 0x26b   : > { %2498 = vmatpush3.bf16.msra.mxu1 %v2683_v9  ;;  %v2730_v9 = vld [vmem:[#allocation13 + $0x24] ss:$16 sps:$4 sm:$0xff]  }
 0x26c   : > { %2499 = vmatprep.subr.bf16.mxu1 %v3043_v5  ;;  %v2217_v5 = vld [vmem:[%s3476_s4] ss:$0 sm:$0xff] }
 0x26d   : > { %2403 = vmatpush3.bf16.msra.mxu0 %v2684_v28  ;;  %v2733_v28 = vld [vmem:[#allocation13 + $0x2c] ss:$16 sps:$4 sm:$0xff]  }
 0x26e   : > { %2404 = vmatprep.subr.bf16.mxu0 %v2685_v29  ;;  %v2728_v29 = vld [vmem:[#allocation13 + $0x20] ss:$16 sps:$4 sm:$0xff]  }
 0x26f   : > { %2500 = vmatpush3.bf16.msra.mxu1 %v2686_v30  ;;  %v2731_v30 = vld [vmem:[#allocation13 + $0x28] ss:$16 sps:$4 sm:$0xff]  }
 0x270   : > { %1750 = vmatprep.subr.bf16.mxu1 %v2697_v35  ;;  %v3045_v35 = vmov 0  }
 0x271   : > { %2405 = vmatpush3.bf16.msra.mxu0 %v2687_v31  ;;  %v2736_v31 = vld [vmem:[#allocation13 + $0x4] ss:$16 sps:$4 sm:$0xff]  }
 0x272   : > { %2406 = vmatprep.subr.bf16.mxu0 %v2689_v32  ;;  %v2739_v32 = vld [vmem:[#allocation13 + $0xc] ss:$16 sps:$4 sm:$0xff]  }
 0x275   : > { %2407 = vmatpush3.bf16.msra.mxu0 %v2690_v33  ;;  %v2734_v33 = vld [vmem:[#allocation13] ss:$16 sps:$4 sm:$0xff]  }
 0x276   : > { %1709 = vmatprep.subr.bf16.mxu0 %v2694_v34  ;;  %v2737_v34 = vld [vmem:[#allocation13 + $0x8] ss:$16 sps:$4 sm:$0xff]  }
 0x312   : > { %v1187_v36 = vpop.f32.mrf.mxu1 }
 0x314   : > { %v2483_v37 = vpop.f32.mrf.mxu1 }
 0x316   : > { %v1190_v38 = vpop.f32.mrf.mxu1 }
 0x318   : > { %v2377_v39 = vpop.f32.mrf.mxu0  ;;  %v2484_v40 = vpop.f32.mrf.mxu1 }
 0x31a   : > { %v2378_v41 = vpop.f32.mrf.mxu0 }
 0x31b   : > { %v2379_v42 = vadd.f32 %v2378_v41, %v2377_v39  ;;  %v2245_v41 = vld [vmem:[%s3478_s6] ss:$0 sm:$0xff] }
 0x31c   : > { %v2380_v43 = vpop.f32.mrf.mxu0 }
 0x31d   : > { %v1148_v44 = vadd.f32 %v2379_v42, %v2217_v5 }
 0x31e   : > { %v2381_v45 = vpop.f32.mrf.mxu0 }
 0x31f   : > { %v1188_v46 = vadd.f32 %v1187_v36, %v1148_v44  ;;  %v2740_v36 = vld [vmem:[#allocation15 + $0x78] sm:$0xff]  }
 0x321   : > { %v1193_v47 = vmax.f32 %v1188_v46, 0.0 }
 0x323   : > { %v3417_v48 = vadd.f32 %v1193_v47, %v3392_v49 }
 0x325   : > { %v2327_v50 = vpack.c.bf16 %v3417_v48, %v3417_v48 }
 0x327   : > { %v1200_v51 = vshrl.u32 %v2327_v50, 16  ;;  %v1203_v53 = vshll.u32 %v2327_v50, 16 }
 0x329   : > { %v1202_v52 = vrot.slane %v1200_v51, 7 }
 0x32b   : > { %v1205_v54 = vor.u32 %v1203_v53, %v1202_v52  ;;  %v1206_v55 = vrot.slane %v1202_v52, 4  ;;  %v2741_v52 = vld [vmem:[#allocation15 + $0x38] sm:$0xff]  }
 0x32d   : > { %v1209_v57 = vsel %vm3370_vm11, %v1205_v54, %v3400_v0  ;;  %v1212_v59 = vsel %vm3345_vm3, %v1206_v55, %v1211_v56  ;;  %v2742_v54 = vld [vmem:[#allocation15 + $0x70] sm:$0xff]   ;;  %v2744_v56 = vld [vmem:[#allocation15 + $0x68] sm:$0xff]  }
 0x32e   : > { %1210 = vst [vmem:[#allocation3] sm:$0xf] %v1209_v57  ;;  %1213 = vst [vmem:[#allocation3 + $0x4] sm:$0x1] %v1212_v59  ;;  %v2743_v55 = vld [vmem:[#allocation15 + $0x30] sm:$0xff]   ;;  %v2745_v57 = vld [vmem:[#allocation15 + $0x28] sm:$0xff]  }
 0x32f   : > { %v2746_v59 = vld [vmem:[#allocation15 + $0x60] sm:$0xff]  }
 0x335   : > { %v1216_v49 = vld [vmem:[#allocation3 + $0x4] sm:$0x1]  ;;  %v1217_v60 = vld [vmem:[#allocation3] sm:$0xe] }
 0x336   : > { %v1215_v61 = vld [vmem:[#allocation3] sm:$0xf]  ;;  %v2244_v62 = vcombine.low %v1217_v60, %v1216_v49 }
 0x337   : > { %v2243_v63 = vcombine.low %v1215_v61, %v1216_v49  ;;  %v2747_v49 = vld [vmem:[#allocation15 + $0x20] sm:$0xff]   ;;  %v2748_v60 = vld [vmem:[#allocation15 + $0x58] sm:$0xff]  }
 0x338   : > { %v1234_v2 = vrot.slane %v2244_v62, 1  ;;  %v2751_v62 = vld [vmem:[#allocation15 + $0x10] sm:$0xff]  }
 0x339   : > { %v1226_v3 = vshll.u32 %v2243_v63, 16  ;;  %v1224_v7 = vshrl.u32 %v2243_v63, 16  ;;  %v2752_v63 = vld [vmem:[#allocation15 + $0x48] sm:$0xff]  }
 0x33a   : > { %2502 = vmatmul.mubr.bf16.vlgmr.msra.gmra.mxu1 %v1234_v2  ;;  %v2754_v2 = vld [vmem:[#allocation15 + $0x40] sm:$0xff]  }
 0x33b   : > { %v1228_v8 = vrot.slane %v1226_v3, 1  ;;  %1751 = vmatpush1.bf16.msra.mxu1 %v2695_v1  ;;  %1782 = vmatprep.mubr.bf16.mxu1 %v3045_v35  ;;  %v2753_v1 = vld [vmem:[#allocation15 + $0x8] sm:$0xff]   ;;  %v2755_v3 = vld [vmem:[#allocation15] sm:$0xff]  }
 0x33c   : > { %1752 = vmatprep.subr.bf16.mxu1 %v2703_v4  ;;  %v1795_v4 = vlaneseq }
 0x33d   : > { %v1229_v0 = vor.u32 %v1228_v8, %v1224_v7 }
 0x33e   : > { %v1796_v7 = vshrl.u32 %v1795_v4, 7 }
 0x33f   : > { %1466 = vmatprep.mubr.bf16.mxu0 %v1229_v0  ;;  %1753 = vmatpush1.bf16.msra.mxu1 %v2701_v58  ;;  %v1791_v0 = vld [vmem:[%s3480_s8] sm:$0x3] }
 0x340   : > { %1467 = vmatmul.mubr.bf16.vlgmr.msra.gmra.mxu0 %v1215_v61  ;;  %1754 = vmatprep.subr.bf16.mxu1 %v2709_v6  ;;  %v2750_v61 = vld [vmem:[#allocation15 + $0x50] sm:$0xff]   ;;  %v1797_v8 = vsub.s32 0, %v1796_v7  ;;  %v1801_v58 = vsub.s32 1, %v1796_v7 }
 0x341   : > { %1710 = vmatpush1.bf16.msra.mxu0 %v2692_v10  ;;  %1741 = vmatprep.mubr.bf16.mxu0 %v3045_v35 }
 0x342   : > { %1711 = vmatprep.subr.bf16.mxu0 %v2700_v11 }
 0x343   : > { %1755 = vmatpush1.bf16.msra.mxu1 %v2707_v12  ;;  %v1798_v12 = vrot.slane %v1791_v0, %v1797_v8 }
 0x344   : > { %1756 = vmatprep.subr.bf16.mxu1 %v2715_v17 }
 0x345   : > { %1712 = vmatpush1.bf16.msra.mxu0 %v2698_v13 }
 0x346   : > { %1713 = vmatprep.subr.bf16.mxu0 %v2706_v14 }
 0x347   : > { %1757 = vmatpush1.bf16.msra.mxu1 %v2713_v19 }
 0x348   : > { %1758 = vmatprep.subr.bf16.mxu1 %v2721_v21 }
 0x349   : > { %1714 = vmatpush1.bf16.msra.mxu0 %v2704_v15  ;;  %v1802_v15 = vrot.slane %v1791_v0, %v1801_v58 }
 0x34a   : > { %1715 = vmatprep.subr.bf16.mxu0 %v2712_v16 }
 0x34b   : > { %1759 = vmatpush1.bf16.msra.mxu1 %v2719_v23 }
 0x34c   : > { %1760 = vmatprep.subr.bf16.mxu1 %v2727_v25 }
 0x34d   : > { %1716 = vmatpush1.bf16.msra.mxu0 %v2710_v18 }
 0x34e   : > { %1717 = vmatprep.subr.bf16.mxu0 %v2718_v20 }
 0x34f   : > { %1761 = vmatpush1.bf16.msra.mxu1 %v2725_v27 }
 0x350   : > { %1762 = vmatprep.subr.bf16.mxu1 %v2733_v28 }
 0x351   : > { %1718 = vmatpush1.bf16.msra.mxu0 %v2716_v22 }
 0x352   : > { %1719 = vmatprep.subr.bf16.mxu0 %v2724_v24 }
 0x353   : > { %1763 = vmatpush1.bf16.msra.mxu1 %v2731_v30 }
 0x354   : > { %1764 = vmatprep.subr.bf16.mxu1 %v2739_v32 }
 0x355   : > { %1720 = vmatpush1.bf16.msra.mxu0 %v2722_v26 }
 0x356   : > { %1721 = vmatprep.subr.bf16.mxu0 %v2730_v9 }
 0x357   : > { %1765 = vmatpush1.bf16.msra.mxu1 %v2737_v34 }
 0x359   : > { %1722 = vmatpush1.bf16.msra.mxu0 %v2728_v29 }
 0x35a   : > { %1723 = vmatprep.subr.bf16.mxu0 %v2736_v31 }
 0x35d   : > { %1724 = vmatpush1.bf16.msra.mxu0 %v2734_v33 }
 0x35e   : > { %2423 = vmatprep.subr.bf16.mxu0 %v2740_v36 }
 0x3fa   : > { %v1508_v37 = vpop.f32.mrf.mxu1 }
 0x3fc   : > { %v2503_v38 = vpop.f32.mrf.mxu1 }
 0x3fe   : > { %v1511_v39 = vpop.f32.mrf.mxu1 }
 0x400   : > { %v2408_v40 = vpop.f32.mrf.mxu0  ;;  %v2504_v5 = vpop.f32.mrf.mxu1 }
 0x402   : > { %v2409_v42 = vpop.f32.mrf.mxu0 }
 0x403   : > { %v2410_v43 = vadd.f32 %v2409_v42, %v2408_v40  ;;  %v2302_v40 = vld [vmem:[%s3482_s10] ss:$0 sm:$0xff] }
 0x404   : > { %v2411_v44 = vpop.f32.mrf.mxu0 }
 0x405   : > { %v1469_v45 = vadd.f32 %v2410_v43, %v2245_v41 }
 0x406   : > { %v2412_v46 = vpop.f32.mrf.mxu0 }
 0x407   : > { %v1509_v47 = vadd.f32 %v1508_v37, %v1469_v45 }
 0x409   : > { %v1514_v50 = vmax.f32 %v1509_v47, 0.0 }
 0x40b   : > { %v1515_v51 = vadd.f32 %v1514_v50, %v3417_v48  ;;  %v2749_v48 = vld [vmem:[#allocation15 + $0x18] sm:$0xff]  }
 0x40d   : > { %v1516_v53 = vpack.c.bf16 %v1515_v51, %v1515_v51 }
 0x40f   : > { %1742 = vmatmul.mubr.bf16.vlgmr.msra.gmra.mxu0 %v1516_v53  ;;  %1783 = vmatmul.mubr.bf16.vlgmr.msra.gmra.mxu1 %v1516_v53 }
 0x410   : > { %2424 = vmatpush3.bf16.msra.mxu0 %v2741_v52 }
 0x411   : > { %2425 = vmatprep.subr.bf16.mxu0 %v2742_v54 }
 0x414   : > { %2426 = vmatpush3.bf16.msra.mxu0 %v2743_v55 }
 0x415   : > { %2427 = vmatprep.subr.bf16.mxu0 %v2744_v56 }
 0x418   : > { %2428 = vmatpush3.bf16.msra.mxu0 %v2745_v57 }
 0x419   : > { %2429 = vmatprep.subr.bf16.mxu0 %v2746_v59 }
 0x41c   : > { %2430 = vmatpush3.bf16.msra.mxu0 %v2747_v49 }
 0x41d   : > { %2431 = vmatprep.subr.bf16.mxu0 %v2748_v60 }
 0x420   : > { %2432 = vmatpush3.bf16.msra.mxu0 %v2749_v48 }
 0x421   : > { %2433 = vmatprep.subr.bf16.mxu0 %v2750_v61 }
 0x424   : > { %2434 = vmatpush3.bf16.msra.mxu0 %v2751_v62 }
 0x425   : > { %2435 = vmatprep.subr.bf16.mxu0 %v2752_v63 }
 0x428   : > { %2436 = vmatpush3.bf16.msra.mxu0 %v2753_v1 }
 0x429   : > { %2437 = vmatprep.subr.bf16.mxu0 %v2754_v2 }
 0x42c   : > { %2438 = vmatpush3.bf16.msra.mxu0 %v2755_v3 }
 0x4cf   : > { %v1743_v10 = vpop.f32.mrf.mxu0  ;;  %v1784_v6 = vpop.f32.mrf.mxu1 }
 0x4d0   : > { %v1811_v11 = vrot.slane %v1784_v6, 1  ;;  %v1792_v16 = vadd.f32 %v1784_v6, %v1743_v10 }
 0x4d1   : > { %v1745_v13 = vpop.f32.mrf.mxu0  ;;  %v1786_v14 = vpop.f32.mrf.mxu1 }
 0x4d2   : > { %v1816_v17 = vsel %vm1815_vm12, %v1811_v11, 0.0  ;;  %v1793_v18 = vadd.f32 %v1786_v14, %v1745_v13  ;;  %v1812_v19 = vrot.slane %v1786_v14, 1  ;;  %v1805_v28 = vadd.f32 %v1798_v12, %v1792_v16 }
 0x4d3   : > { %v1818_v20 = vadd.f32 %v1816_v17, %v1743_v10  ;;  %v1747_v21 = vpop.f32.mrf.mxu0  ;;  %v1788_v22 = vpop.f32.mrf.mxu1 }
 0x4d4   : > { %v1817_v23 = vsel %vm1815_vm12, %v1812_v19, 0.0  ;;  %v1806_v25 = vadd.f32 %v1802_v15, %v1793_v18  ;;  %v1807_v33 = vmax.f32 %v1805_v28, 0.0 }
 0x4d5   : > { %v1820_v24 = vadd.f32 %v1818_v20, %v1798_v12  ;;  %v1819_v26 = vadd.f32 %v1817_v23, %v1745_v13  ;;  %v1748_v27 = vpop.f32.mrf.mxu0  ;;  %v1789_v9 = vpop.f32.mrf.mxu1 }
 0x4d6   : > { %v1808_v31 = vmax.f32 %v1806_v25, 0.0 }
 0x4d7   : > { %v1821_v29 = vadd.f32 %v1819_v26, %v1802_v15  ;;  %v1822_v30 = vmax.f32 %v1820_v24, 0.0 }
 0x4d9   : > { %v1823_v32 = vmax.f32 %v1821_v29, 0.0  ;;  %v1824_v35 = vpack.c.bf16 %v1822_v30, %v1807_v33 }
 0x4db   : > { %v1825_v34 = vpack.c.bf16 %v1823_v32, %v1808_v31 }
 0x4dd   : > { %1993 = vmatprep.mubr.bf16.mxu0 %v1825_v34 }
 0x4de   : > { %1994 = vmatmul.mubr.bf16.vlgmr.msra.gmra.mxu0 %v1824_v35 }
 0x59e   : > { %v2439_v36 = vpop.f32.mrf.mxu0 }
 0x5a0   : > { %v2440_v37 = vpop.f32.mrf.mxu0 }
 0x5a1   : > { %v2441_v39 = vadd.f32 %v2440_v37, %v2439_v36 }
 0x5a2   : > { %v2442_v38 = vpop.f32.mrf.mxu0 }
 0x5a3   : > { %v1996_v42 = vadd.f32 %v2441_v39, %v2302_v40 }
 0x5a4   : > { %v2443_v5 = vpop.f32.mrf.mxu0 }
 0x5a5   : > { %v2444_v41 = vadd.f32 %v2443_v5, %v2442_v38 }
 0x5a7   : > { %v1999_v43 = vadd.f32 %v2444_v41, %v2302_v40 }
 0x5a9   : > { %v2328_v44 = vpack.c.bf16 %v1999_v43, %v1996_v42 }
 0x5ab   : > { %2010 = vst [vmem:[%s510_s27] sm:$0xff] %v2328_v44 }
 0x5ac   : > { %2963 = shalt.err (!%p2960_p8)
}
 0x5ad   : > { %s2964_s30 = scalar_lea.hbm %s2024_s2, 128  ;;  %s2968_s3 = scalar_lea.hbm %s3483_s11, 256 }
 0x5ae   : > { %p2965_p7 = scmp.ne.s32.totalorder %s2024_s2, %s2964_s30  ;;  %p2969_p2 = scmp.lt.s32.totalorder %s2024_s2, %s3483_s11 }
 0x5af   : > { %p2970_p10 = scmp.lt.s32.totalorder %s2968_s3, %s2964_s30 }
 0x5b0   : > { %p2966_p12 = pnand %p2965_p7, %p3531_p13 }
 0x5b1   : > { %p2971_p11 = por %p2970_p10, %p2969_p2 }
 0x5b2   : > { %p2967_p6 = pneg %p2966_p12 }
 0x5b4   : > { %p2972_p0 = pnand %p2971_p11, %p2967_p6 }
 0x5b6   : > { %2975 = shalt.err (!%p2972_p0)
}
 0x5b7   : > { %2529 = dma.vmem_to_hbm [thread:$0]  (%p3531_p13), %s2027_s14, 128, %s2024_s2, %s2012_s7  }
 0x5b8 PF: > { %s2038_s9 = sand.u32 1, %s3018_s17   ;;  %p3532_p5 = scmp.ne.s32.totalorder %s3515_s16, 0 }
 0x5b9   : > { %p3533_p9 = scmp.ge.s32.totalorder %s3030_s20, 2  ;;  %s2039_s12 = scalar_lea.sflag [#allocation6], %s2038_s9 }
 0x5bb   : > { %p2555_p1 = pnand %p3533_p9, %p3532_p5 }
 0x5bd   : > { %p2556_p3 = pneg %p2555_p1 }
 0x5bf   : > { %3013 = dma.done.wait (%p2556_p3), %s2039_s12, 128  }
 0x5c0   : > { %3015 = vsyncadd (%p2556_p3), %s2039_s12, 4294967168  ;;  %s3534_s20 = sld [smem:[#allocation24_spill]]  ;;  %s3537_s17 = smov %s3022_s18 }
 0x5c1   : > { %s3535_s26 = sld [smem:[#allocation23_spill]] }
 0x5c2   : > { %s3536_s19 = sld [smem:[#allocation25_spill]] }
 0x5c6   : > { %p29_p4 = scmp.ge.s32.totalorder %s3534_s20, 4  }
 0x5c7   : > { %s3538_s18 = smov %s3535_s26 }
 0x5c8   :  { %31 = sbr.rel (!%p29_p4) target bundleno = 15 (0xf), region = 142 }
 0x5cd   :  { %2044 = vsyncpa [#allocation5], 1 }
 0x5ce   :  { %2046 = vsyncpa [#allocation5 + $0x1], 1 }
 0x5cf   :  { %2047 = vsyncpa [#allocation8], 1 }
 0x5d0   :  { %2049 = vsyncpa [#allocation8 + $0x1], 1 }
 0x5d1   :  { %2050 = vsyncpa [#allocation11], 1 }
 0x5d2   :  { %2051 = vsyncpa [#allocation14], 1 }
 0x5d3   :  { %2052 = vsyncpa [#allocation6], 1 }
 0x5d4   :  { %2054 = vsyncpa [#allocation6 + $0x1], 1 }

</bundles_post_ra>
